<compile_context>
chip_gen: v7x
topology: tpu7x:2x2x1
jax: 0.10.0
libtpu: 0.0.40
codegen_flags: <defaults>
</compile_context>

<pallas_src>
import math
import functools

import jax
import jax.numpy as jnp
from jax import lax
from jax.experimental import pallas as pl
from jax.experimental.pallas import tpu as pltpu  # noqa: F401  (kept for TPU-specific tuning hooks)


_PREC = lax.Precision.HIGHEST


def _mm(a, b):
    """Plain (M,K) @ (K,N) on the MXU, f32 accumulate."""
    return jnp.dot(a, b, precision=_PREC, preferred_element_type=jnp.float32)


def _mm_t(a, b):
    """a @ b.T without materializing b.T (contract last dims of both)."""
    return lax.dot_general(a, b, (((1,), (1,)), ((), ())),
                           precision=_PREC, preferred_element_type=jnp.float32)


# ---------------------------------------------------------------------------
# Fused Pallas kernel (single invocation, no grid -- whole problem in VMEM)
# ---------------------------------------------------------------------------

def _fused_mha_kernel(xq_ref, xkv_ref, w_qkv_ref, b_qkv_ref, w_out_ref,
                      b_out_ref, o_ref, *, num_heads, batch, scale):
    """One-shot multi-head cross-attention over all batches at once.

    xq_ref   : (L*N, E)  query tokens, rows ordered (l, n)
    xkv_ref  : (S*N, E)  key/value tokens, rows ordered (s, n)
    w_qkv_ref: (3, E, E) pre-transposed q/k/v projection weights (x @ W layout)
    b_qkv_ref: (3, 1, E) q/k/v projection biases
    w_out_ref: (E, E)    pre-transposed output projection weight
    b_out_ref: (1, E)
    o_ref    : (L*N, E)  rows ordered (l, n)
    """
    LN, E = xq_ref.shape
    SN = xkv_ref.shape[0]
    hd = E // num_heads

    xq = xq_ref[...]            # (LN, E)
    xkv = xkv_ref[...]          # (SN, E)

    # Input projections -- one matmul each for ALL tokens / batches.
    q = _mm(xq, w_qkv_ref[0]) + b_qkv_ref[0]       # (LN, E)
    k = _mm(xkv, w_qkv_ref[1]) + b_qkv_ref[1]      # (SN, E)
    v = _mm(xkv, w_qkv_ref[2]) + b_qkv_ref[2]      # (SN, E)

    # Static cross-batch additive mask: rows/cols are (seq, batch)-ordered, so
    # query row r and key col c belong to the same batch iff r % N == c % N.
    row_b = lax.broadcasted_iota(jnp.int32, (LN, SN), 0) % batch
    col_b = lax.broadcasted_iota(jnp.int32, (LN, SN), 1) % batch
    neg_mask = jnp.where(row_b == col_b, 0.0, -1e30).astype(jnp.float32)

    heads = []
    for h in range(num_heads):                     # static unroll (num_heads=4)
        c0 = h * hd
        qh = q[:, c0:c0 + hd]                      # (LN, hd)
        kh = k[:, c0:c0 + hd]                      # (SN, hd)
        vh = v[:, c0:c0 + hd]                      # (SN, hd)

        s = _mm_t(qh, kh) * scale + neg_mask       # (LN, SN)
        s = s - jnp.max(s, axis=-1, keepdims=True)
        p = jnp.exp(s)
        p = p / jnp.sum(p, axis=-1, keepdims=True)  # exact divide
        # attention dropout (p=0.2) is identity in eval mode
        heads.append(_mm(p, vh))                   # (LN, hd)

    attn = jnp.concatenate(heads, axis=-1)                  # (LN, E) lane-dense
    out = _mm(attn, w_out_ref[...]) + b_out_ref[...]        # (LN, E)
    o_ref[...] = out.astype(o_ref.dtype)                    # single store


# ---------------------------------------------------------------------------
# Host wrappers
# ---------------------------------------------------------------------------

def prepare_params(params, embed_dim):
    """One-time host-side repack of the PyTorch parameter layout."""
    E = embed_dim
    w_in = params["in_proj_weight"]                # (3E, E), PyTorch (out, in)
    w_qkv = w_in.reshape(3, E, E).transpose(0, 2, 1)   # (3, E, E), x @ W layout
    b_qkv = params["in_proj_bias"].reshape(3, 1, E)
    w_out_t = params["out_proj_weight"].T          # (E, E)
    b_out = params["out_proj_bias"].reshape(1, E)
    return {"w_qkv": w_qkv, "b_qkv": b_qkv, "w_out_t": w_out_t, "b_out": b_out}


def cross_attention_forward(thesis_feature, llm_feature, kparams, num_heads):
    """Equivalent of Cross_Attention_Module.forward in eval mode.

    thesis_feature: (L, N, E) query
    llm_feature:    (S, N, E) key / value
    returns:        (L, N, E)
    """
    L, N, E = thesis_feature.shape
    S = llm_feature.shape[0]
    hd = E // num_heads
    scale = 1.0 / math.sqrt(hd)

    # Free leading-dim collapses -- NO transposes around the kernel.
    xq = thesis_feature.reshape(L * N, E)          # rows ordered (l, n)
    xkv = llm_feature.reshape(S * N, E)            # rows ordered (s, n)

    kernel = functools.partial(_fused_mha_kernel, num_heads=num_heads,
                               batch=N, scale=scale)
    out = pl.pallas_call(
        kernel,
        out_shape=jax.ShapeDtypeStruct((L * N, E), thesis_feature.dtype),
        in_specs=[
            pl.BlockSpec((L * N, E), lambda: (0, 0)),
            pl.BlockSpec((S * N, E), lambda: (0, 0)),
            pl.BlockSpec((3, E, E), lambda: (0, 0, 0)),
            pl.BlockSpec((3, 1, E), lambda: (0, 0, 0)),
            pl.BlockSpec((E, E), lambda: (0, 0)),
            pl.BlockSpec((1, E), lambda: (0, 0)),
        ],
        out_specs=pl.BlockSpec((L * N, E), lambda: (0, 0)),
    )(xq, xkv, kparams["w_qkv"], kparams["b_qkv"],
      kparams["w_out_t"], kparams["b_out"])

    # Outer nn.Dropout(p=0.2) is identity in eval mode.
    return out.reshape(L, N, E)


# ---------------------------------------------------------------------------
# Pure-JAX reference (correctness check, mirrors PyTorch MHA math)
# ---------------------------------------------------------------------------

def reference_forward(thesis_feature, llm_feature, params, num_heads):
    L, N, E = thesis_feature.shape
    S = llm_feature.shape[0]
    hd = E // num_heads
    w_in, b_in = params["in_proj_weight"], params["in_proj_bias"]
    w_out, b_out = params["out_proj_weight"], params["out_proj_bias"]
    wq, wk, wv = w_in[:E], w_in[E:2 * E], w_in[2 * E:]
    bq, bk, bv = b_in[:E], b_in[E:2 * E], b_in[2 * E:]

    dot = functools.partial(jnp.dot, precision=_PREC)
    q = dot(thesis_feature.reshape(L * N, E), wq.T) + bq
    k = dot(llm_feature.reshape(S * N, E), wk.T) + bk
    v = dot(llm_feature.reshape(S * N, E), wv.T) + bv

    q = q.reshape(L, N * num_heads, hd).transpose(1, 0, 2)
    k = k.reshape(S, N * num_heads, hd).transpose(1, 0, 2)
    v = v.reshape(S, N * num_heads, hd).transpose(1, 0, 2)

    s = jnp.einsum("bld,bsd->bls", q, k, precision=_PREC) / math.sqrt(hd)
    p = jax.nn.softmax(s, axis=-1)
    a = jnp.einsum("bls,bsd->bld", p, v, precision=_PREC)
    a = a.transpose(1, 0, 2).reshape(L, N, E)
    return (dot(a.reshape(L * N, E), w_out.T) + b_out).reshape(L, N, E)


# ---------------------------------------------------------------------------
# Deterministic parameter init (xavier-uniform-ish, fixed key)
# ---------------------------------------------------------------------------

def init_params(key, embed_dim):
    k1, k2, k3, k4 = jax.random.split(key, 4)
    E = embed_dim
    bound_in = math.sqrt(6.0 / (E + 3 * E))
    bound_out = math.sqrt(6.0 / (E + E))
    return {
        "in_proj_weight": jax.random.uniform(k1, (3 * E, E), jnp.float32,
                                             -bound_in, bound_in),
        "in_proj_bias": jax.random.uniform(k3, (3 * E,), jnp.float32, -0.1, 0.1),
        "out_proj_weight": jax.random.uniform(k2, (E, E), jnp.float32,
                                              -bound_out, bound_out),
        "out_proj_bias": jax.random.uniform(k4, (E,), jnp.float32, -0.1, 0.1),
    }


if __name__ == "__main__":
    embed_dim = 32
    num_heads = 4
    L, S, N = 8, 8, 2   # query-seq, key-seq, batch

    root = jax.random.PRNGKey(0)
    kp, kq, kk = jax.random.split(root, 3)
    params = init_params(kp, embed_dim)
    kparams = prepare_params(params, embed_dim)   # one-time weight repack

    thesis_feature = jax.random.normal(kq, (L, N, embed_dim), jnp.float32)
    llm_feature = jax.random.normal(kk, (S, N, embed_dim), jnp.float32)

    out = cross_attention_forward(thesis_feature, llm_feature, kparams, num_heads)
    out = jax.block_until_ready(out)

    ref = reference_forward(thesis_feature, llm_feature, params, num_heads)
    assert out.shape == (L, N, embed_dim)
    assert jnp.allclose(out, ref, atol=1e-4, rtol=1e-4), "mismatch vs reference"

    print("KERNEL_OK")
</pallas_src>

<mosaic_0001>
module attributes {stable_mosaic.version = 11 : i64} {
  func.func @_fused_mha_kernel(%arg0: memref<16x32xf32, #tpu.memory_space<vmem>>, %arg1: memref<16x32xf32, #tpu.memory_space<vmem>>, %arg2: memref<3x32x32xf32, #tpu.memory_space<vmem>>, %arg3: memref<3x1x32xf32, #tpu.memory_space<vmem>>, %arg4: memref<32x32xf32, #tpu.memory_space<vmem>>, %arg5: memref<1x32xf32, #tpu.memory_space<vmem>>, %arg6: memref<16x32xf32, #tpu.memory_space<vmem>>) attributes {dimension_semantics = [], scalar_prefetch = 0 : i64, scratch_operands = 0 : i64, tpu.core_type = #tpu.core_type<tc>} {
    %c0 = arith.constant 0 : index
    %c0_0 = arith.constant 0 : index
    %0 = vector.load %arg0[%c0, %c0_0] : memref<16x32xf32, #tpu.memory_space<vmem>>, vector<16x32xf32>
    %c0_1 = arith.constant 0 : index
    %c0_2 = arith.constant 0 : index
    %1 = vector.load %arg1[%c0_1, %c0_2] : memref<16x32xf32, #tpu.memory_space<vmem>>, vector<16x32xf32>
    %c0_3 = arith.constant 0 : index
    %c0_4 = arith.constant 0 : index
    %c0_5 = arith.constant 0 : index
    %2 = vector.load %arg2[%c0_3, %c0_4, %c0_5] : memref<3x32x32xf32, #tpu.memory_space<vmem>>, vector<1x32x32xf32>
    %3 = vector.shape_cast %2 : vector<1x32x32xf32> to vector<32x32xf32>
    %cst = arith.constant dense<0.000000e+00> : vector<16x32xf32>
    %4 = tpu.matmul %0, %3, %cst {dimension_numbers = #tpu.dot_dimension_numbers<[1], [0], [0], [1], [0, 0, 1, 1], [], []>, precision = #tpu.contract_precision<fp32>} : vector<16x32xf32>, vector<32x32xf32>, vector<16x32xf32> -> vector<16x32xf32>
    %c0_6 = arith.constant 0 : index
    %c0_7 = arith.constant 0 : index
    %c0_8 = arith.constant 0 : index
    %5 = vector.load %arg3[%c0_6, %c0_7, %c0_8] : memref<3x1x32xf32, #tpu.memory_space<vmem>>, vector<1x1x32xf32>
    %6 = vector.shape_cast %5 : vector<1x1x32xf32> to vector<1x32xf32>
    %7 = vector.broadcast %6 : vector<1x32xf32> to vector<16x32xf32>
    %8 = arith.addf %4, %7 : vector<16x32xf32>
    %c1 = arith.constant 1 : index
    %c0_9 = arith.constant 0 : index
    %c0_10 = arith.constant 0 : index
    %9 = vector.load %arg2[%c1, %c0_9, %c0_10] : memref<3x32x32xf32, #tpu.memory_space<vmem>>, vector<1x32x32xf32>
    %10 = vector.shape_cast %9 : vector<1x32x32xf32> to vector<32x32xf32>
    %cst_11 = arith.constant dense<0.000000e+00> : vector<16x32xf32>
    %11 = tpu.matmul %1, %10, %cst_11 {dimension_numbers = #tpu.dot_dimension_numbers<[1], [0], [0], [1], [0, 0, 1, 1], [], []>, precision = #tpu.contract_precision<fp32>} : vector<16x32xf32>, vector<32x32xf32>, vector<16x32xf32> -> vector<16x32xf32>
    %c1_12 = arith.constant 1 : index
    %c0_13 = arith.constant 0 : index
    %c0_14 = arith.constant 0 : index
    %12 = vector.load %arg3[%c1_12, %c0_13, %c0_14] : memref<3x1x32xf32, #tpu.memory_space<vmem>>, vector<1x1x32xf32>
    %13 = vector.shape_cast %12 : vector<1x1x32xf32> to vector<1x32xf32>
    %14 = vector.broadcast %13 : vector<1x32xf32> to vector<16x32xf32>
    %15 = arith.addf %11, %14 : vector<16x32xf32>
    %c2 = arith.constant 2 : index
    %c0_15 = arith.constant 0 : index
    %c0_16 = arith.constant 0 : index
    %16 = vector.load %arg2[%c2, %c0_15, %c0_16] : memref<3x32x32xf32, #tpu.memory_space<vmem>>, vector<1x32x32xf32>
    %17 = vector.shape_cast %16 : vector<1x32x32xf32> to vector<32x32xf32>
    %cst_17 = arith.constant dense<0.000000e+00> : vector<16x32xf32>
    %18 = tpu.matmul %1, %17, %cst_17 {dimension_numbers = #tpu.dot_dimension_numbers<[1], [0], [0], [1], [0, 0, 1, 1], [], []>, precision = #tpu.contract_precision<fp32>} : vector<16x32xf32>, vector<32x32xf32>, vector<16x32xf32> -> vector<16x32xf32>
    %c2_18 = arith.constant 2 : index
    %c0_19 = arith.constant 0 : index
    %c0_20 = arith.constant 0 : index
    %19 = vector.load %arg3[%c2_18, %c0_19, %c0_20] : memref<3x1x32xf32, #tpu.memory_space<vmem>>, vector<1x1x32xf32>
    %20 = vector.shape_cast %19 : vector<1x1x32xf32> to vector<1x32xf32>
    %21 = vector.broadcast %20 : vector<1x32xf32> to vector<16x32xf32>
    %22 = arith.addf %18, %21 : vector<16x32xf32>
    %23 = tpu.iota {dimensions = array<i32: 0>} : vector<16x16xi32>
    %c2_i32 = arith.constant 2 : i32
    %c0_i32 = arith.constant 0 : i32
    %24 = arith.cmpi eq, %c2_i32, %c0_i32 : i32
    %c1_i32 = arith.constant 1 : i32
    %25 = arith.select %24, %c1_i32, %c2_i32 : i32
    %26 = vector.broadcast %25 : i32 to vector<16x16xi32>
    %27 = arith.remsi %23, %26 : vector<16x16xi32>
    %c0_i32_21 = arith.constant 0 : i32
    %28 = vector.broadcast %c0_i32_21 : i32 to vector<16x16xi32>
    %29 = arith.cmpi ne, %27, %28 : vector<16x16xi32>
    %c0_i32_22 = arith.constant 0 : i32
    %30 = vector.broadcast %c0_i32_22 : i32 to vector<16x16xi32>
    %31 = arith.cmpi slt, %27, %30 : vector<16x16xi32>
    %c0_i32_23 = arith.constant 0 : i32
    %32 = arith.cmpi slt, %25, %c0_i32_23 : i32
    %33 = vector.broadcast %32 : i1 to vector<16x16xi1>
    %34 = vector.broadcast %33 : vector<16x16xi1> to vector<16x16xi1>
    %35 = arith.xori %31, %34 : vector<16x16xi1>
    %36 = arith.andi %35, %29 : vector<16x16xi1>
    %37 = vector.broadcast %25 : i32 to vector<16x16xi32>
    %38 = arith.addi %27, %37 : vector<16x16xi32>
    %39 = arith.select %36, %38, %27 : vector<16x16xi1>, vector<16x16xi32>
    %40 = tpu.iota {dimensions = array<i32: 1>} : vector<16x16xi32>
    %c2_i32_24 = arith.constant 2 : i32
    %c0_i32_25 = arith.constant 0 : i32
    %41 = arith.cmpi eq, %c2_i32_24, %c0_i32_25 : i32
    %c1_i32_26 = arith.constant 1 : i32
    %42 = arith.select %41, %c1_i32_26, %c2_i32_24 : i32
    %43 = vector.broadcast %42 : i32 to vector<16x16xi32>
    %44 = arith.remsi %40, %43 : vector<16x16xi32>
    %c0_i32_27 = arith.constant 0 : i32
    %45 = vector.broadcast %c0_i32_27 : i32 to vector<16x16xi32>
    %46 = arith.cmpi ne, %44, %45 : vector<16x16xi32>
    %c0_i32_28 = arith.constant 0 : i32
    %47 = vector.broadcast %c0_i32_28 : i32 to vector<16x16xi32>
    %48 = arith.cmpi slt, %44, %47 : vector<16x16xi32>
    %c0_i32_29 = arith.constant 0 : i32
    %49 = arith.cmpi slt, %42, %c0_i32_29 : i32
    %50 = vector.broadcast %49 : i1 to vector<16x16xi1>
    %51 = vector.broadcast %50 : vector<16x16xi1> to vector<16x16xi1>
    %52 = arith.xori %48, %51 : vector<16x16xi1>
    %53 = arith.andi %52, %46 : vector<16x16xi1>
    %54 = vector.broadcast %42 : i32 to vector<16x16xi32>
    %55 = arith.addi %44, %54 : vector<16x16xi32>
    %56 = arith.select %53, %55, %44 : vector<16x16xi1>, vector<16x16xi32>
    %57 = arith.cmpi eq, %39, %56 : vector<16x16xi32>
    %cst_30 = arith.constant 0.000000e+00 : f32
    %cst_31 = arith.constant -1.000000e+30 : f32
    %58 = vector.broadcast %cst_30 : f32 to vector<16x16xf32>
    %59 = vector.broadcast %cst_31 : f32 to vector<16x16xf32>
    %60 = arith.select %57, %58, %59 : vector<16x16xi1>, vector<16x16xf32>
    %61 = vector.extract_strided_slice %8 {offsets = [0, 0], sizes = [16, 8], strides = [1, 1]} : vector<16x32xf32> to vector<16x8xf32>
    %62 = vector.extract_strided_slice %15 {offsets = [0, 0], sizes = [16, 8], strides = [1, 1]} : vector<16x32xf32> to vector<16x8xf32>
    %63 = vector.extract_strided_slice %22 {offsets = [0, 0], sizes = [16, 8], strides = [1, 1]} : vector<16x32xf32> to vector<16x8xf32>
    %cst_32 = arith.constant dense<0.000000e+00> : vector<16x16xf32>
    %64 = tpu.matmul %61, %62, %cst_32 {dimension_numbers = #tpu.dot_dimension_numbers<[1], [1], [0], [0], [0, 0, 1, 0], [], []>, precision = #tpu.contract_precision<fp32>} : vector<16x8xf32>, vector<16x8xf32>, vector<16x16xf32> -> vector<16x16xf32>
    %cst_33 = arith.constant 0.353553385 : f32
    %65 = vector.broadcast %cst_33 : f32 to vector<16x16xf32>
    %66 = arith.mulf %64, %65 : vector<16x16xf32>
    %67 = arith.addf %66, %60 : vector<16x16xf32>
    %cst_34 = arith.constant dense<0xFF800000> : vector<16xf32>
    %68 = vector.multi_reduction <maximumf>, %67, %cst_34 [1] : vector<16x16xf32> to vector<16xf32>
    %69 = vector.shape_cast %68 : vector<16xf32> to vector<16x1xf32>
    %70 = vector.broadcast %69 : vector<16x1xf32> to vector<16x16xf32>
    %71 = arith.subf %67, %70 : vector<16x16xf32>
    %72 = math.exp %71 : vector<16x16xf32>
    %cst_35 = arith.constant dense<0.000000e+00> : vector<16xf32>
    %73 = vector.multi_reduction <add>, %72, %cst_35 [1] : vector<16x16xf32> to vector<16xf32>
    %74 = vector.shape_cast %73 : vector<16xf32> to vector<16x1xf32>
    %75 = vector.broadcast %74 : vector<16x1xf32> to vector<16x16xf32>
    %76 = arith.divf %72, %75 : vector<16x16xf32>
    %cst_36 = arith.constant dense<0.000000e+00> : vector<16x8xf32>
    %77 = tpu.matmul %76, %63, %cst_36 {dimension_numbers = #tpu.dot_dimension_numbers<[1], [0], [0], [1], [0, 0, 1, 1], [], []>, precision = #tpu.contract_precision<fp32>} : vector<16x16xf32>, vector<16x8xf32>, vector<16x8xf32> -> vector<16x8xf32>
    %78 = vector.extract_strided_slice %8 {offsets = [0, 8], sizes = [16, 8], strides = [1, 1]} : vector<16x32xf32> to vector<16x8xf32>
    %79 = vector.extract_strided_slice %15 {offsets = [0, 8], sizes = [16, 8], strides = [1, 1]} : vector<16x32xf32> to vector<16x8xf32>
    %80 = vector.extract_strided_slice %22 {offsets = [0, 8], sizes = [16, 8], strides = [1, 1]} : vector<16x32xf32> to vector<16x8xf32>
    %cst_37 = arith.constant dense<0.000000e+00> : vector<16x16xf32>
    %81 = tpu.matmul %78, %79, %cst_37 {dimension_numbers = #tpu.dot_dimension_numbers<[1], [1], [0], [0], [0, 0, 1, 0], [], []>, precision = #tpu.contract_precision<fp32>} : vector<16x8xf32>, vector<16x8xf32>, vector<16x16xf32> -> vector<16x16xf32>
    %cst_38 = arith.constant 0.353553385 : f32
    %82 = vector.broadcast %cst_38 : f32 to vector<16x16xf32>
    %83 = arith.mulf %81, %82 : vector<16x16xf32>
    %84 = arith.addf %83, %60 : vector<16x16xf32>
    %cst_39 = arith.constant dense<0xFF800000> : vector<16xf32>
    %85 = vector.multi_reduction <maximumf>, %84, %cst_39 [1] : vector<16x16xf32> to vector<16xf32>
    %86 = vector.shape_cast %85 : vector<16xf32> to vector<16x1xf32>
    %87 = vector.broadcast %86 : vector<16x1xf32> to vector<16x16xf32>
    %88 = arith.subf %84, %87 : vector<16x16xf32>
    %89 = math.exp %88 : vector<16x16xf32>
    %cst_40 = arith.constant dense<0.000000e+00> : vector<16xf32>
    %90 = vector.multi_reduction <add>, %89, %cst_40 [1] : vector<16x16xf32> to vector<16xf32>
    %91 = vector.shape_cast %90 : vector<16xf32> to vector<16x1xf32>
    %92 = vector.broadcast %91 : vector<16x1xf32> to vector<16x16xf32>
    %93 = arith.divf %89, %92 : vector<16x16xf32>
    %cst_41 = arith.constant dense<0.000000e+00> : vector<16x8xf32>
    %94 = tpu.matmul %93, %80, %cst_41 {dimension_numbers = #tpu.dot_dimension_numbers<[1], [0], [0], [1], [0, 0, 1, 1], [], []>, precision = #tpu.contract_precision<fp32>} : vector<16x16xf32>, vector<16x8xf32>, vector<16x8xf32> -> vector<16x8xf32>
    %95 = vector.extract_strided_slice %8 {offsets = [0, 16], sizes = [16, 8], strides = [1, 1]} : vector<16x32xf32> to vector<16x8xf32>
    %96 = vector.extract_strided_slice %15 {offsets = [0, 16], sizes = [16, 8], strides = [1, 1]} : vector<16x32xf32> to vector<16x8xf32>
    %97 = vector.extract_strided_slice %22 {offsets = [0, 16], sizes = [16, 8], strides = [1, 1]} : vector<16x32xf32> to vector<16x8xf32>
    %cst_42 = arith.constant dense<0.000000e+00> : vector<16x16xf32>
    %98 = tpu.matmul %95, %96, %cst_42 {dimension_numbers = #tpu.dot_dimension_numbers<[1], [1], [0], [0], [0, 0, 1, 0], [], []>, precision = #tpu.contract_precision<fp32>} : vector<16x8xf32>, vector<16x8xf32>, vector<16x16xf32> -> vector<16x16xf32>
    %cst_43 = arith.constant 0.353553385 : f32
    %99 = vector.broadcast %cst_43 : f32 to vector<16x16xf32>
    %100 = arith.mulf %98, %99 : vector<16x16xf32>
    %101 = arith.addf %100, %60 : vector<16x16xf32>
    %cst_44 = arith.constant dense<0xFF800000> : vector<16xf32>
    %102 = vector.multi_reduction <maximumf>, %101, %cst_44 [1] : vector<16x16xf32> to vector<16xf32>
    %103 = vector.shape_cast %102 : vector<16xf32> to vector<16x1xf32>
    %104 = vector.broadcast %103 : vector<16x1xf32> to vector<16x16xf32>
    %105 = arith.subf %101, %104 : vector<16x16xf32>
    %106 = math.exp %105 : vector<16x16xf32>
    %cst_45 = arith.constant dense<0.000000e+00> : vector<16xf32>
    %107 = vector.multi_reduction <add>, %106, %cst_45 [1] : vector<16x16xf32> to vector<16xf32>
    %108 = vector.shape_cast %107 : vector<16xf32> to vector<16x1xf32>
    %109 = vector.broadcast %108 : vector<16x1xf32> to vector<16x16xf32>
    %110 = arith.divf %106, %109 : vector<16x16xf32>
    %cst_46 = arith.constant dense<0.000000e+00> : vector<16x8xf32>
    %111 = tpu.matmul %110, %97, %cst_46 {dimension_numbers = #tpu.dot_dimension_numbers<[1], [0], [0], [1], [0, 0, 1, 1], [], []>, precision = #tpu.contract_precision<fp32>} : vector<16x16xf32>, vector<16x8xf32>, vector<16x8xf32> -> vector<16x8xf32>
    %112 = vector.extract_strided_slice %8 {offsets = [0, 24], sizes = [16, 8], strides = [1, 1]} : vector<16x32xf32> to vector<16x8xf32>
    %113 = vector.extract_strided_slice %15 {offsets = [0, 24], sizes = [16, 8], strides = [1, 1]} : vector<16x32xf32> to vector<16x8xf32>
    %114 = vector.extract_strided_slice %22 {offsets = [0, 24], sizes = [16, 8], strides = [1, 1]} : vector<16x32xf32> to vector<16x8xf32>
    %cst_47 = arith.constant dense<0.000000e+00> : vector<16x16xf32>
    %115 = tpu.matmul %112, %113, %cst_47 {dimension_numbers = #tpu.dot_dimension_numbers<[1], [1], [0], [0], [0, 0, 1, 0], [], []>, precision = #tpu.contract_precision<fp32>} : vector<16x8xf32>, vector<16x8xf32>, vector<16x16xf32> -> vector<16x16xf32>
    %cst_48 = arith.constant 0.353553385 : f32
    %116 = vector.broadcast %cst_48 : f32 to vector<16x16xf32>
    %117 = arith.mulf %115, %116 : vector<16x16xf32>
    %118 = arith.addf %117, %60 : vector<16x16xf32>
    %cst_49 = arith.constant dense<0xFF800000> : vector<16xf32>
    %119 = vector.multi_reduction <maximumf>, %118, %cst_49 [1] : vector<16x16xf32> to vector<16xf32>
    %120 = vector.shape_cast %119 : vector<16xf32> to vector<16x1xf32>
    %121 = vector.broadcast %120 : vector<16x1xf32> to vector<16x16xf32>
    %122 = arith.subf %118, %121 : vector<16x16xf32>
    %123 = math.exp %122 : vector<16x16xf32>
    %cst_50 = arith.constant dense<0.000000e+00> : vector<16xf32>
    %124 = vector.multi_reduction <add>, %123, %cst_50 [1] : vector<16x16xf32> to vector<16xf32>
    %125 = vector.shape_cast %124 : vector<16xf32> to vector<16x1xf32>
    %126 = vector.broadcast %125 : vector<16x1xf32> to vector<16x16xf32>
    %127 = arith.divf %123, %126 : vector<16x16xf32>
    %cst_51 = arith.constant dense<0.000000e+00> : vector<16x8xf32>
    %128 = tpu.matmul %127, %114, %cst_51 {dimension_numbers = #tpu.dot_dimension_numbers<[1], [0], [0], [1], [0, 0, 1, 1], [], []>, precision = #tpu.contract_precision<fp32>} : vector<16x16xf32>, vector<16x8xf32>, vector<16x8xf32> -> vector<16x8xf32>
    %129 = tpu.concatenate %77, %94, %111, %128 in 1 : vector<16x8xf32>, vector<16x8xf32>, vector<16x8xf32>, vector<16x8xf32> -> vector<16x32xf32>
    %c0_52 = arith.constant 0 : index
    %c0_53 = arith.constant 0 : index
    %130 = vector.load %arg4[%c0_52, %c0_53] : memref<32x32xf32, #tpu.memory_space<vmem>>, vector<32x32xf32>
    %cst_54 = arith.constant dense<0.000000e+00> : vector<16x32xf32>
    %131 = tpu.matmul %129, %130, %cst_54 {dimension_numbers = #tpu.dot_dimension_numbers<[1], [0], [0], [1], [0, 0, 1, 1], [], []>, precision = #tpu.contract_precision<fp32>} : vector<16x32xf32>, vector<32x32xf32>, vector<16x32xf32> -> vector<16x32xf32>
    %c0_55 = arith.constant 0 : index
    %c0_56 = arith.constant 0 : index
    %132 = vector.load %arg5[%c0_55, %c0_56] : memref<1x32xf32, #tpu.memory_space<vmem>>, vector<1x32xf32>
    %133 = vector.broadcast %132 : vector<1x32xf32> to vector<16x32xf32>
    %134 = arith.addf %131, %133 : vector<16x32xf32>
    %c0_57 = arith.constant 0 : index
    %c0_58 = arith.constant 0 : index
    %135 = vector.load %arg6[%c0_57, %c0_58] : memref<16x32xf32, #tpu.memory_space<vmem>>, vector<16x32xf32>
    tpu.vector_store %arg6[%c0_57, %c0_58], %134 {strides = array<i32>} : memref<16x32xf32, #tpu.memory_space<vmem>>, vector<16x32xf32>,
    return
  }
}

</mosaic_0001>

<bundles_post_ra>
// kernel: tpu_custom_call.1
= control target key start
LH: loop header
LB: loop body
LE: loop exit
PB: predicated region body
PF: predicated region fallthrough
CT: control target
= control target key end

     0   :  { %11 = vsyncpa [#allocation3], 0  ;;  %s8687_s0 = inlined_call_operand.hbm [shape: f32[16,32], index: 0, kind: input, shape index: {}]   ;;  %s8688_s1 = inlined_call_operand.hbm [shape: f32[16,32], index: 1, kind: input, shape index: {}]   ;;  %s8689_s2 = inlined_call_operand.hbm [shape: f32[3,32,32], index: 2, kind: input, shape index: {}]   ;;  %s8690_s3 = inlined_call_operand.vmem [shape: f32[3,1,32], index: 3, kind: input, shape index: {}]   ;;  %s8691_s4 = inlined_call_operand.hbm [shape: f32[32,32], index: 4, kind: input, shape index: {}]   ;;  %s8692_s5 = inlined_call_operand.vmem [shape: f32[1,32], index: 5, kind: input, shape index: {}]   ;;  %s8693_s6 = inlined_call_operand.hbm [shape: f32[16,32], index: 6, kind: output, shape index: {}]  }
   0x1   :  { %12 = vsyncpa [#allocation6], 0 }
   0x2   :  { %13 = vsyncpa [#allocation9], 0 }
   0x3   :  { %14 = vsyncpa [#allocation4], 0  ;;  %s8202_s21 = smov [#allocation5]   ;;  %s8203_s23 = smov [#allocation2]  }
   0x4   :  { %s32_s22 = sshll.u32 %s8202_s21, 4  ;;  %s20_s24 = sshll.u32 %s8203_s23, 4  ;;  %s33_s22 = int_to_ptr.vmem [resolvable:$true] %s32_s22  ;;  %s8250_s24 = int_to_ptr.vmem [resolvable:$true] %s20_s24 }
   0x5   :  { %s8084_s27 = scalar_lea.hbm %s8688_s1, 256 }
   0x6   :  { %p8085_p0 = scmp.ne.s32.totalorder %s8688_s1, %s8084_s27  ;;  %p8088_p1 = scmp.lt.u32.totalorder %s8084_s27, %s8688_s1 }
   0x8   :  { %p8090_p2 = pnand %p8088_p1, %p8085_p0 }
   0xa   :  { %8093 = shalt.err (!%p8090_p2)
}
   0xb   :  { %s8094_s8 = scalar_lea.vmem %s33_s22, 256  ;;  %p8099_p4 = scmp.lt.s32.totalorder %s33_s22, %s33_s22 }
   0xc   :  { %p8095_p3 = scmp.ne.s32.totalorder %s33_s22, %s8094_s8  ;;  %p8100_p5 = scmp.lt.s32.totalorder %s8094_s8, %s8094_s8 }
   0xe   :  { %p8101_p6 = por %p8100_p5, %p8099_p4 }
  0x10   :  { %p8102_p7 = pnand %p8101_p6, %p8095_p3 }
  0x12   :  { %8105 = shalt.err (!%p8102_p7)
}
  0x13   :  { %s8204_s9 = smov 128   ;;  %s8205_s10 = smov 8  }
  0x14   :  { %38 = dma.hbm_to_vmem [thread:$0]  %s8688_s1, 256, %s33_s22, [#allocation6], %s8204_s9, %s8204_s9, %s8205_s10  }
  0x15   :  { %s8106_s15 = scalar_lea.hbm %s8687_s0, 256 }
  0x16   :  { %p8107_p8 = scmp.ne.s32.totalorder %s8687_s0, %s8106_s15  ;;  %p8110_p9 = scmp.lt.u32.totalorder %s8106_s15, %s8687_s0 }
  0x18   :  { %p8112_p10 = pnand %p8110_p9, %p8107_p8 }
  0x1a   :  { %8115 = shalt.err (!%p8112_p10)
}
  0x1b   :  { %s8116_s20 = scalar_lea.vmem %s8250_s24, 256  ;;  %p8121_p12 = scmp.lt.s32.totalorder %s8250_s24, %s8250_s24 }
  0x1c   :  { %p8117_p11 = scmp.ne.s32.totalorder %s8250_s24, %s8116_s20  ;;  %p8122_p13 = scmp.lt.s32.totalorder %s8116_s20, %s8116_s20 }
  0x1e   :  { %p8123_p0 = por %p8122_p13, %p8121_p12 }
  0x20   :  { %p8124_p1 = pnand %p8123_p0, %p8117_p11 }
  0x22   :  { %8127 = shalt.err (!%p8124_p1)
}
  0x23   :  { %26 = dma.hbm_to_vmem [thread:$0]  %s8687_s0, 256, %s8250_s24, [#allocation3], %s8204_s9, %s8204_s9, %s8205_s10  }
  0x24   :  { %s8206_s22 = smov [#allocation7]   ;;  %s8207_s25 = smov [#allocation8]  }
  0x25   :  { %s44_s23 = sshll.u32 %s8206_s22, 4  ;;  %s58_s26 = sshll.u32 %s8207_s25, 4  ;;  %s45_s23 = int_to_ptr.vmem [resolvable:$true] %s44_s23  ;;  %s8287_s26 = int_to_ptr.vmem [resolvable:$true] %s58_s26 }
  0x26   :  { %s8128_s29 = scalar_lea.hbm %s8689_s2, 1536 }
  0x27   :  { %p8129_p2 = scmp.ne.s32.totalorder %s8689_s2, %s8128_s29  ;;  %p8132_p3 = scmp.lt.u32.totalorder %s8128_s29, %s8689_s2 }
  0x29   :  { %p8134_p4 = pnand %p8132_p3, %p8129_p2 }
  0x2b   :  { %8137 = shalt.err (!%p8134_p4)
}
  0x2c   :  { %s8138_s0 = scalar_lea.vmem %s45_s23, 1536  ;;  %p8143_p6 = scmp.lt.s32.totalorder %s45_s23, %s45_s23 }
  0x2d   :  { %p8139_p5 = scmp.ne.s32.totalorder %s45_s23, %s8138_s0  ;;  %p8144_p7 = scmp.lt.s32.totalorder %s8138_s0, %s8138_s0 }
  0x2f   :  { %p8145_p8 = por %p8144_p7, %p8143_p6 }
  0x31   :  { %p8146_p9 = pnand %p8145_p8, %p8139_p5 }
  0x33   :  { %8149 = shalt.err (!%p8146_p9)
}
  0x34   :  { %50 = dma.hbm_to_vmem [thread:$0]  %s8689_s2, 1536, %s45_s23, [#allocation6], %s8204_s9, %s8204_s9, %s8205_s10  }
  0x35   :  { %s8150_s15 = scalar_lea.hbm %s8691_s4, 512 }
  0x36   :  { %p8151_p10 = scmp.ne.s32.totalorder %s8691_s4, %s8150_s15  ;;  %p8154_p11 = scmp.lt.u32.totalorder %s8150_s15, %s8691_s4 }
  0x38   :  { %p8156_p12 = pnand %p8154_p11, %p8151_p10 }
  0x3a   :  { %8159 = shalt.err (!%p8156_p12)
}
  0x3b   :  { %s8160_s20 = scalar_lea.vmem %s8287_s26, 512  ;;  %p8165_p0 = scmp.lt.s32.totalorder %s8287_s26, %s8287_s26 }
  0x3c   :  { %p8161_p13 = scmp.ne.s32.totalorder %s8287_s26, %s8160_s20  ;;  %p8166_p1 = scmp.lt.s32.totalorder %s8160_s20, %s8160_s20 }
  0x3e   :  { %p8167_p2 = por %p8166_p1, %p8165_p0 }
  0x40   :  { %p8168_p3 = pnand %p8167_p2, %p8161_p13 }
  0x42   :  { %8171 = shalt.err (!%p8168_p3)
}
  0x43   :  { %64 = dma.hbm_to_vmem [thread:$0]  %s8691_s4, 512, %s8287_s26, [#allocation9], %s8204_s9, %s8204_s9, %s8205_s10  }
  0x44   :  { %8194 = dma.done.wait [#allocation3], 256  }
  0x45   :  { %8195 = vsyncadd [#allocation3], 4294967040 }
  0x46   :  { %8196 = dma.done.wait [#allocation6], 1792  }
  0x47   :  { %8197 = vsyncadd [#allocation6], 4294965504 }
  0x48   :  { %8198 = dma.done.wait [#allocation9], 512  }
  0x49   :  { %8199 = vsyncadd [#allocation9], 4294966784  ;;  %vm94_vm0 = vcmask 261120   ;;  %v83_v0 = vld [vmem:[#allocation7] sm:$0xff]  ;;  %v84_v1 = vld [vmem:[#allocation7 + $0x8] sm:$0xff]  ;;  %vm1762_vm1 = vcmask 64512  }
  0x4a   :  { %v85_v2 = vld [vmem:[#allocation7 + $0x10] sm:$0xff]  ;;  %v102_v3 = vand.u32 4294901760, %v83_v0  ;;  %v105_v4 = vand.u32 4294901760, %v84_v1  ;;  %v86_v5 = vld [vmem:[#allocation7 + $0x18] sm:$0xff]  ;;  %v79_v7 = vld [vmem:[#allocation2] sm:$0xff]  ;;  %s8208_s22 = smov 120  }
  0x4b   :  { %v108_v6 = vand.u32 4294901760, %v85_v2  ;;  %v80_v8 = vld [vmem:[#allocation2 + $0x8] sm:$0xff]  ;;  %v111_v9 = vand.u32 4294901760, %v86_v5  ;;  %v96_v10 = vsel %vm94_vm0, %v79_v7, 0  ;;  %v630_v33 = vld [vmem:[#allocation7 + $0x20] sm:$0xff]  ;;  %v81_v38 = vld [vmem:[#allocation5] sm:$0xff] }
  0x4c   :  { %v99_v11 = vsel %vm94_vm0, %v80_v8, 0  ;;  %v8326_v12 = vpack.c.bf16 %v105_v4, %v102_v3  ;;  %v8328_v13 = vand.u32 4294901760, %v96_v10  ;;  %v192_v15 = vsub.f32 %v83_v0, %v102_v3  ;;  %v631_v37 = vld [vmem:[#allocation7 + $0x28] sm:$0xff]  ;;  %v82_v50 = vld [vmem:[#allocation5 + $0x8] sm:$0xff]  ;;  %v632_v51 = vld [vmem:[#allocation7 + $0x30] sm:$0xff]  ;;  %s8211_s28 = smov 104  }
  0x4d   :  { %v8330_v14 = vand.u32 4294901760, %v99_v11  ;;  %v8332_v16 = vpack.c.bf16 %v111_v9, %v108_v6  ;;  %v199_v17 = vsub.f32 %v84_v1, %v105_v4  ;;  %v8334_v18 = vsub.f32 %v85_v2, %v108_v6  ;;  %v633_v52 = vld [vmem:[#allocation7 + $0x38] sm:$0xff]  ;;  %s8212_s29 = smov 16   ;;  %s8213_s30 = smov 24  }
  0x4e   :  { %v8336_v19 = vsub.f32 %v86_v5, %v111_v9  ;;  %7528 = vmatprep.subr.bf16.mxu1 %v8326_v12  ;;  %7552 = vmatprep.subr.bf16.mxu0 %v8326_v12  ;;  %v8341_v20 = vsub.f32 %v96_v10, %v8328_v13  ;;  %v193_v22 = vand.u32 4294901760, %v192_v15  ;;  %v649_v45 = vand.u32 4294901760, %v630_v33  ;;  %s8214_s11 = smov [#allocation10]  }
  0x4f   :  { %v8344_v21 = vsub.f32 %v99_v11, %v8330_v14  ;;  %7530 = vmatpush3.bf16.msra.mxu1 %v8326_v12  ;;  %7554 = vmatpush3.bf16.msra.mxu0 %v8326_v12  ;;  %v200_v23 = vand.u32 4294901760, %v199_v17  ;;  %v207_v24 = vand.u32 4294901760, %v8334_v18  ;;  %v652_v48 = vand.u32 4294901760, %v631_v37  ;;  %s6571_s0 = sshll.u32 %s8214_s11, 4  ;;  %s6572_s0 = int_to_ptr.vmem [resolvable:$true] %s6571_s0 }
  0x50   :  { %v214_v25 = vand.u32 4294901760, %v8336_v19  ;;  %7532 = vmatprep.subr.bf16.mxu1 %v8332_v16  ;;  %7556 = vmatprep.subr.bf16.mxu0 %v8332_v16  ;;  %v172_v26 = vand.u32 4294901760, %v8341_v20  ;;  %v194_v28 = vsub.f32 %v192_v15, %v193_v22  ;;  %v643_v49 = vsel %vm94_vm0, %v81_v38, 0  ;;  %s8172_s24 = scalar_lea.vmem %s6572_s0, 256  ;;  %p8177_p5 = scmp.lt.s32.totalorder %s6572_s0, %s6572_s0 }
  0x51   :  { %v182_v27 = vand.u32 4294901760, %v8344_v21  ;;  %v201_v29 = vsub.f32 %v199_v17, %v200_v23  ;;  %v7559_v30 = vpack.c.bf16 %v200_v23, %v193_v22  ;;  %v208_v31 = vsub.f32 %v8334_v18, %v207_v24  ;;  %p8173_p4 = scmp.ne.s32.totalorder %s6572_s0, %s8172_s24  ;;  %p8178_p6 = scmp.lt.s32.totalorder %s8172_s24, %s8172_s24 }
  0x52   :  { %v215_v32 = vsub.f32 %v8336_v19, %v214_v25  ;;  %v173_v34 = vsub.f32 %v8341_v20, %v172_v26  ;;  %v195_v36 = vand.u32 4294901760, %v194_v28  ;;  %6968 = vmatprep.mubr.f32.mxu0 %v172_v26  ;;  %v7563_v44 = vpack.c.bf16 %v214_v25, %v207_v24  ;;  %v6585_v28 = vld [vmem:[%s8690_s3] ss:$0 sm:$0xff] }
  0x53   :  { %v183_v35 = vsub.f32 %v8344_v21, %v182_v27  ;;  %7534 = vmatpush3.bf16.msra.mxu1 %v8332_v16  ;;  %7558 = vmatpush3.bf16.msra.mxu0 %v8332_v16  ;;  %v202_v39 = vand.u32 4294901760, %v201_v29  ;;  %v209_v40 = vand.u32 4294901760, %v208_v31  ;;  %v8361_v53 = vand.u32 4294901760, %v643_v49  ;;  %p8179_p7 = por %p8178_p6, %p8177_p5 }
  0x54   :  { %v216_v41 = vand.u32 4294901760, %v215_v32  ;;  %v174_v42 = vand.u32 4294901760, %v173_v34  ;;  %7560 = vmatprep.subr.bf16.mxu0 %v7559_v30  ;;  %v7543_v54 = vpack.c.bf16 %v199_v17, %v192_v15  ;;  %v646_v56 = vsel %vm94_vm0, %v82_v50, 0 }
  0x55   :  { %v184_v43 = vand.u32 4294901760, %v183_v35  ;;  %v7535_v46 = vpack.c.bf16 %v202_v39, %v195_v36  ;;  %v8364_v55 = vsub.f32 %v643_v49, %v8361_v53  ;;  %v655_v57 = vand.u32 4294901760, %v632_v51  ;;  %p8180_p8 = pnand %p8179_p7, %p8173_p4 }
  0x56   :  { %v7539_v47 = vpack.c.bf16 %v216_v41, %v209_v40  ;;  %6935 = vmatprep.mubr.f32.mxu1 %v174_v42  ;;  %6969 = vmatmul.mubr.f32.vlgmr.msra.gmra.mrb[0].mxu0 %v182_v27  ;;  %v658_v58 = vand.u32 4294901760, %v633_v52  ;;  %v8367_v59 = vsub.f32 %v630_v33, %v649_v45  ;;  %v8369_v60 = vsub.f32 %v631_v37, %v652_v48 }
  0x57   :  { %6936 = vmatmul.mubr.f32.vlgmr.msra.gmra.mrb[0].mxu1 %v184_v43  ;;  %7536 = vmatprep.subr.bf16.mxu1 %v7535_v46  ;;  %v8373_v61 = vand.u32 4294901760, %v646_v56  ;;  %v7547_v62 = vpack.c.bf16 %v8336_v19, %v8334_v18  ;;  %v8378_v63 = vand.u32 4294901760, %v8364_v55  ;;  %v8383_v2 = vsub.f32 %v632_v51, %v655_v57 }
  0x58   :  { %7538 = vmatpush3.bf16.msra.mxu1 %v7535_v46  ;;  %7562 = vmatpush3.bf16.msra.mxu0 %v7559_v30  ;;  %v740_v0 = vand.u32 4294901760, %v8367_v59  ;;  %v747_v1 = vand.u32 4294901760, %v8369_v60  ;;  %v760_v3 = vsub.f32 %v633_v52, %v658_v58  ;;  %v7575_v5 = vpack.c.bf16 %v652_v48, %v649_v45 }
  0x59   :  { %7540 = vmatprep.subr.bf16.mxu1 %v7539_v47  ;;  %7564 = vmatprep.subr.bf16.mxu0 %v7563_v44  ;;  %v8388_v4 = vsub.f32 %v646_v56, %v8373_v61  ;;  %v720_v6 = vsub.f32 %v8364_v55, %v8378_v63  ;;  %v754_v9 = vand.u32 4294901760, %v8383_v2  ;;  %vm2281_vm4 = vcmask 130048  }
  0x5a   :  { %6946 = vmatprep.mubr.f32.mxu1 %v8328_v13  ;;  %6979 = vmatprep.mubr.f32.mxu0 %v8328_v13  ;;  %v741_v7 = vsub.f32 %v8367_v59, %v740_v0  ;;  %v748_v8 = vsub.f32 %v8369_v60, %v747_v1  ;;  %v761_v10 = vand.u32 4294901760, %v760_v3  ;;  %v7607_v26 = vpack.c.bf16 %v747_v1, %v740_v0 }
  0x5b   :  { %v8400_v11 = vand.u32 4294901760, %v8388_v4  ;;  %v721_v15 = vand.u32 4294901760, %v720_v6  ;;  %v755_v19 = vsub.f32 %v8383_v2, %v754_v9  ;;  %vm6016_vm5 = vcmask 195584  }
  0x5c   :  { %7542 = vmatpush3.bf16.msra.mxu1 %v7539_v47  ;;  %7566 = vmatpush3.bf16.msra.mxu0 %v7563_v44  ;;  %v742_v17 = vand.u32 4294901760, %v741_v7  ;;  %v749_v18 = vand.u32 4294901760, %v748_v8  ;;  %v762_v22 = vsub.f32 %v760_v3, %v761_v10  ;;  %v7611_v27 = vpack.c.bf16 %v761_v10, %v754_v9  ;;  %v6587_v44 = vld [vmem:[%s8690_s3 + $0x1] ss:$0 sm:$0xff] }
  0x5d   :  { %7544 = vmatprep.subr.bf16.mxu1 %v7543_v54  ;;  %7568 = vmatprep.subr.bf16.mxu0 %v8326_v12 }
  0x5e   :  { %v763_v23 = vand.u32 4294901760, %v762_v22 }
  0x5f   :  { %6947 = vmatmul.mubr.f32.vlgmr.msra.gmra.mrb[0].mxu1 %v8330_v14  ;;  %6980 = vmatmul.mubr.f32.vlgmr.msra.gmra.mrb[0].mxu0 %v8330_v14 }
  0x60   :  { %7546 = vmatpush3.bf16.msra.mxu1 %v7543_v54  ;;  %7570 = vmatpush3.bf16.msra.mxu0 %v8326_v12  ;;  %v7579_v12 = vpack.c.bf16 %v658_v58, %v655_v57 }
  0x61   :  { %7548 = vmatprep.subr.bf16.mxu1 %v7547_v62  ;;  %7572 = vmatprep.subr.bf16.mxu0 %v8332_v16 }
  0x62   :  { %6957 = vmatprep.mubr.f32.mxu1 %v8341_v20  ;;  %6990 = vmatprep.mubr.f32.mxu0 %v8328_v13  ;;  %v730_v13 = vsub.f32 %v8388_v4, %v8400_v11  ;;  %v7583_v20 = vpack.c.bf16 %v749_v18, %v742_v17 }
  0x64   :  { %7550 = vmatpush3.bf16.msra.mxu1 %v7547_v62  ;;  %7574 = vmatpush3.bf16.msra.mxu0 %v8332_v16  ;;  %v756_v16 = vand.u32 4294901760, %v755_v19  ;;  %v8408_v24 = vand.u32 4294901760, %v730_v13 }
  0x65   :  { %7576 = vmatprep.subr.bf16.mxu1 %v7575_v5 }
  0x66   :  { %v7587_v25 = vpack.c.bf16 %v763_v23, %v756_v16 }
  0x67   :  { %6958 = vmatmul.mubr.f32.vlgmr.msra.gmra.mrb[0].mxu1 %v8344_v21  ;;  %6991 = vmatmul.mubr.f32.vlgmr.msra.gmra.mrb[0].mxu0 %v8330_v14  ;;  %v7591_v14 = vpack.c.bf16 %v8369_v60, %v8367_v59  ;;  %v7595_v21 = vpack.c.bf16 %v760_v3, %v8383_v2 }
  0x68   :  { %7578 = vmatpush3.bf16.msra.mxu1 %v7575_v5  ;;  %7001 = vmatprep.mubr.f32.mxu1 %v721_v15 }
  0x69   :  { %7580 = vmatprep.subr.bf16.mxu1 %v7579_v12  ;;  %7067 = vmatprep.mubr.f32.mxu0 %v721_v15 }
  0x6c   :  { %7582 = vmatpush3.bf16.msra.mxu1 %v7579_v12 }
  0x6d   :  { %7584 = vmatprep.subr.bf16.mxu1 %v7583_v20 }
  0x6f   :  { %7002 = vmatmul.mubr.f32.vlgmr.msra.gmra.mrb[2].mxu1 %v8408_v24 }
  0x70   :  { %7586 = vmatpush3.bf16.msra.mxu1 %v7583_v20  ;;  %7012 = vmatprep.mubr.f32.mxu1 %v8361_v53 }
  0x71   :  { %7588 = vmatprep.subr.bf16.mxu1 %v7587_v25 }
  0x74   :  { %7590 = vmatpush3.bf16.msra.mxu1 %v7587_v25 }
  0x75   :  { %7592 = vmatprep.subr.bf16.mxu1 %v7591_v14 }
  0x77   :  { %7013 = vmatmul.mubr.f32.vlgmr.msra.gmra.mrb[2].mxu1 %v8373_v61 }
  0x78   :  { %7594 = vmatpush3.bf16.msra.mxu1 %v7591_v14  ;;  %7023 = vmatprep.mubr.f32.mxu1 %v8364_v55 }
  0x79   :  { %7596 = vmatprep.subr.bf16.mxu1 %v7595_v21 }
  0x7c   :  { %7598 = vmatpush3.bf16.msra.mxu1 %v7595_v21 }
  0x7d   :  { %7600 = vmatprep.subr.bf16.mxu1 %v7575_v5 }
  0x7f   :  { %7024 = vmatmul.mubr.f32.vlgmr.msra.gmra.mrb[2].mxu1 %v8388_v4 }
  0x80   :  { %7602 = vmatpush3.bf16.msra.mxu1 %v7575_v5  ;;  %7034 = vmatprep.mubr.f32.mxu1 %v8378_v63 }
  0x81   :  { %7604 = vmatprep.subr.bf16.mxu1 %v7579_v12 }
  0x84   :  { %7606 = vmatpush3.bf16.msra.mxu1 %v7579_v12 }
  0x85   :  { %7608 = vmatprep.subr.bf16.mxu1 %v7607_v26 }
  0x87   :  { %7035 = vmatmul.mubr.f32.vlgmr.msra.gmra.mrb[2].mxu1 %v8400_v11 }
  0x88   :  { %7610 = vmatpush3.bf16.msra.mxu1 %v7607_v26  ;;  %7045 = vmatprep.mubr.f32.mxu1 %v8361_v53 }
  0x89   :  { %7612 = vmatprep.subr.bf16.mxu1 %v7611_v27 }
  0x8c   :  { %7614 = vmatpush3.bf16.msra.mxu1 %v7611_v27 }
  0x8d   :  { %7616 = vmatprep.subr.bf16.mxu1 %v7575_v5 }
  0x8f   :  { %7046 = vmatmul.mubr.f32.vlgmr.msra.gmra.mrb[2].mxu1 %v8373_v61 }
  0x90   :  { %7618 = vmatpush3.bf16.msra.mxu1 %v7575_v5  ;;  %7056 = vmatprep.mubr.f32.mxu1 %v8361_v53 }
  0x91   :  { %7620 = vmatprep.subr.bf16.mxu1 %v7579_v12 }
  0x94   :  { %7622 = vmatpush3.bf16.msra.mxu1 %v7579_v12 }
  0x97   :  { %7057 = vmatmul.mubr.f32.vlgmr.msra.gmra.mrb[2].mxu1 %v8373_v61 }
 0x13a   :  { %v6959_v29 = vpop.f32.mrb[0].mxu1  ;;  %v6992_v30 = vpop.f32.mrb[0].mxu0 }
 0x13b   :  { %v7911_v31 = vadd.f32 %v6959_v29, %v6585_v28  ;;  %v363_v32 = vpop.f32.mrb[1].mxu1  ;;  %v619_v33 = vpop.f32.mrb[1].mxu0 }
 0x13c   :  { %v7913_v34 = vadd.f32 %v6585_v28, %v363_v32 }
 0x13d   :  { %v8427_v35 = vadd.f32 %v7911_v31, %v6992_v30 }
 0x13e   :  { %v8429_v36 = vadd.f32 %v7913_v34, %v619_v33 }
 0x13f   :  { %v1767_v43 = vsel %vm1762_vm1, %v8427_v35, 0 }
 0x140   :  { %v1764_v37 = vsel %vm1762_vm1, %v8429_v36, 0  ;;  %2812 = vrot.lane.b32.xlu1 %v8429_v36, %s8208_s22  ;;  %v1852_v45 = vand.u32 4294901760, %v1767_v43 }
 0x141   :  { %v1842_v38 = vand.u32 4294901760, %v1764_v37 }
 0x142   :  { %v1853_v50 = vsub.f32 %v1767_v43, %v1852_v45 }
 0x143   :  { %v1843_v39 = vsub.f32 %v1764_v37, %v1842_v38 }
 0x144   :  { %2814 = vrot.lane.b32.xlu1 %v8427_v35, %s8208_s22  ;;  %v1854_v60 = vand.u32 4294901760, %v1853_v50 }
 0x145   :  { %v1844_v40 = vand.u32 4294901760, %v1843_v39 }
 0x146   :  { %v1855_v2 = vsub.f32 %v1853_v50, %v1854_v60 }
 0x147   :  { %v1845_v41 = vsub.f32 %v1843_v39, %v1844_v40 }
 0x148   :  { %v1856_v7 = vand.u32 4294901760, %v1855_v2 }
 0x149   :  { %v1846_v42 = vand.u32 4294901760, %v1845_v41 }
 0x14b   :  { %7129 = vmatprep.mubr.f32.mxu1 %v1846_v42 }
 0x16a   :  { %v7058_v46 = vpop.f32.mrb[2].mxu1 }
 0x16b   :  { %v8442_v47 = vadd.f32 %v7058_v46, %v6587_v44  ;;  %v1166_v48 = vpop.f32.mrb[3].mxu1  ;;  %v1177_v46 = vld [vmem:[#allocation7 + $0x40] sm:$0xff] }
 0x16c   :  { %v8444_v49 = vadd.f32 %v6587_v44, %v1166_v48  ;;  %v1178_v48 = vld [vmem:[#allocation7 + $0x48] sm:$0xff] }
 0x16d   :  { %v1773_v51 = vsel %vm1762_vm1, %v8442_v47, 0 }
 0x16e   :  { %v1779_v52 = vand.u32 4294901760, %v1773_v51  ;;  %v1770_v54 = vsel %vm1762_vm1, %v8444_v49, 0  ;;  %2816 = vrot.lane.b32.xlu0 %v8444_v49, %s8208_s22 }
 0x16f   :  { %v1776_v56 = vand.u32 4294901760, %v1770_v54 }
 0x170   :  { %v1871_v57 = vsub.f32 %v1773_v51, %v1779_v52  ;;  %v1190_v51 = vand.u32 4294901760, %v1177_v46 }
 0x171   :  { %v7671_v58 = vpack.c.bf16 %v1779_v52, %v1776_v56  ;;  %v1864_v59 = vsub.f32 %v1770_v54, %v1776_v56  ;;  %v1193_v52 = vand.u32 4294901760, %v1178_v48  ;;  %v1180_v54 = vld [vmem:[#allocation7 + $0x58] sm:$0xff] }
 0x172   :  { %2818 = vrot.lane.b32.xlu0 %v8442_v47, %s8208_s22  ;;  %v1872_v62 = vand.u32 4294901760, %v1871_v57 }
 0x173   :  { %7672 = vmatprep.subr.bf16.mxu1 %v7671_v58  ;;  %v1865_v0 = vand.u32 4294901760, %v1864_v59  ;;  %v7679_v9 = vpack.c.bf16 %v1871_v57, %v1864_v59 }
 0x174   :  { %7674 = vmatpush3.bf16.xpose.msra.mxu1 %v7671_v58  ;;  %v1873_v1 = vsub.f32 %v1871_v57, %v1872_v62  ;;  %v1199_v57 = vand.u32 4294901760, %v1180_v54 }
 0x175   :  { %v1866_v3 = vsub.f32 %v1864_v59, %v1865_v0  ;;  %v7687_v10 = vpack.c.bf16 %v1872_v62, %v1865_v0  ;;  %v1280_v59 = vsub.f32 %v1177_v46, %v1190_v51 }
 0x176   :  { %v1874_v5 = vand.u32 4294901760, %v1873_v1  ;;  %v1301_v1 = vsub.f32 %v1180_v54, %v1199_v57 }
 0x177   :  { %v1867_v6 = vand.u32 4294901760, %v1866_v3  ;;  %v1281_v3 = vand.u32 4294901760, %v1280_v59 }
 0x179   :  { %v7675_v8 = vpack.c.bf16 %v1874_v5, %v1867_v6 }
 0x17b   :  { %7130 = vmatmul.mubr.f32.vlgmr.msra.gmra.mrb[4].mxu1 %v1856_v7  ;;  %7676 = vmatprep.subr.bf16.mxu1 %v7675_v8  ;;  %v1302_v7 = vand.u32 4294901760, %v1301_v1 }
 0x17c   :  { %7678 = vmatpush3.bf16.xpose.msra.mxu1 %v7675_v8  ;;  %7136 = vmatprep.mubr.f32.mxu1 %v1842_v38  ;;  %v1282_v8 = vsub.f32 %v1280_v59, %v1281_v3 }
 0x17d   :  { %7680 = vmatprep.subr.bf16.mxu1 %v7679_v9 }
 0x183   :  { %7137 = vmatmul.mubr.f32.vlgmr.msra.gmra.mrb[4].mxu1 %v1852_v45 }
 0x184   :  { %7682 = vmatpush3.bf16.xpose.msra.mxu1 %v7679_v9  ;;  %7143 = vmatprep.mubr.f32.mxu1 %v1843_v39 }
 0x185   :  { %7684 = vmatprep.subr.bf16.mxu1 %v7671_v58 }
 0x18b   :  { %7144 = vmatmul.mubr.f32.vlgmr.msra.gmra.mrb[4].mxu1 %v1853_v50  ;;  %v1179_v50 = vld [vmem:[#allocation7 + $0x50] sm:$0xff] }
 0x18c   :  { %7686 = vmatpush3.bf16.xpose.msra.mxu1 %v7671_v58  ;;  %7150 = vmatprep.mubr.f32.mxu1 %v1844_v40  ;;  %v1196_v56 = vand.u32 4294901760, %v1179_v50 }
 0x18d   :  { %7688 = vmatprep.subr.bf16.mxu1 %v7687_v10 }
 0x18e   :  { %v1294_v62 = vsub.f32 %v1179_v50, %v1196_v56  ;;  %v8477_v0 = vpack.c.bf16 %v1199_v57, %v1196_v56  ;;  %v6589_v50 = vld [vmem:[%s8690_s3 + $0x2] ss:$0 sm:$0xff]  ;;  %s8210_s3 = smov 112  }
 0x190   :  { %v1295_v6 = vand.u32 4294901760, %v1294_v62 }
 0x193   :  { %7151 = vmatmul.mubr.f32.vlgmr.msra.gmra.mrb[4].mxu1 %v1854_v60  ;;  %v1287_v60 = vsub.f32 %v1178_v48, %v1193_v52 }
 0x194   :  { %7690 = vmatpush3.bf16.xpose.msra.mxu1 %v7687_v10  ;;  %7157 = vmatprep.mubr.f32.mxu1 %v1842_v38  ;;  %v1296_v10 = vsub.f32 %v1294_v62, %v1295_v6 }
 0x195   :  { %7692 = vmatprep.subr.bf16.mxu1 %v7671_v58  ;;  %v1288_v5 = vand.u32 4294901760, %v1287_v60 }
 0x197   :  { %v1289_v9 = vsub.f32 %v1287_v60, %v1288_v5 }
 0x19b   :  { %7158 = vmatmul.mubr.f32.vlgmr.msra.gmra.mrb[4].mxu1 %v1852_v45 }
 0x19c   :  { %7694 = vmatpush3.bf16.xpose.msra.mxu1 %v7671_v58  ;;  %7164 = vmatprep.mubr.f32.mxu1 %v1842_v38  ;;  %v8475_v58 = vpack.c.bf16 %v1193_v52, %v1190_v51 }
 0x19e   :  { %7624 = vmatprep.subr.bf16.mxu0 %v8475_v58 }
 0x19f   :  { %7626 = vmatpush3.bf16.msra.mxu0 %v8475_v58 }
 0x1a0   :  { %7628 = vmatprep.subr.bf16.mxu0 %v8477_v0 }
 0x1a3   :  { %7165 = vmatmul.mubr.f32.vlgmr.msra.gmra.mrb[4].mxu1 %v1852_v45  ;;  %7630 = vmatpush3.bf16.msra.mxu0 %v8477_v0 }
 0x1a6   :  { %7068 = vmatmul.mubr.f32.vlgmr.msra.gmra.mrb[2].mxu0 %v8408_v24  ;;  %v7655_v24 = vpack.c.bf16 %v1288_v5, %v1281_v3 }
 0x1a7   :  { %7078 = vmatprep.mubr.f32.mxu0 %v8361_v53 }
 0x1b2   :  { %v2813_v12 = vpop.permute.xlu1 %2812 }
 0x1b3   :  { %v2820_v15 = vsel %vm1762_vm1, %v2813_v12, 0  ;;  %v1303_v12 = vsub.f32 %v1301_v1, %v1302_v7 }
 0x1b4   :  { %v8455_v17 = vand.u32 4294901760, %v2820_v15 }
 0x1b6   :  { %v2896_v18 = vsub.f32 %v2820_v15, %v8455_v17  ;;  %v2815_v20 = vpop.permute.xlu1 %2814  ;;  %v1283_v15 = vand.u32 4294901760, %v1282_v8 }
 0x1b7   :  { %v2822_v16 = vsel %vm1762_vm1, %v2815_v20, 0 }
 0x1b8   :  { %v2897_v19 = vand.u32 4294901760, %v2896_v18  ;;  %v8459_v23 = vand.u32 4294901760, %v2822_v16 }
 0x1ba   :  { %v2898_v22 = vsub.f32 %v2896_v18, %v2897_v19  ;;  %v8463_v26 = vsub.f32 %v2822_v16, %v8459_v23  ;;  %v7639_v16 = vpack.c.bf16 %v1287_v60, %v1280_v59 }
 0x1bc   :  { %v2899_v13 = vand.u32 4294901760, %v2898_v22  ;;  %v2907_v32 = vand.u32 4294901760, %v8463_v26  ;;  %v1297_v22 = vand.u32 4294901760, %v1296_v10 }
 0x1be   :  { %7213 = vmatprep.mubr.f32.mxu1 %v2899_v13  ;;  %v2908_v39 = vsub.f32 %v8463_v26, %v2907_v32  ;;  %v1304_v13 = vand.u32 4294901760, %v1303_v12 }
 0x1c0   :  { %v2909_v43 = vand.u32 4294901760, %v2908_v39 }
 0x1e0   :  { %v2817_v25 = vpop.permute.xlu0 %2816 }
 0x1e1   :  { %v2824_v14 = vsel %vm1762_vm1, %v2817_v25, 0  ;;  %v7643_v25 = vpack.c.bf16 %v1301_v1, %v1294_v62 }
 0x1e2   :  { %v2829_v21 = vand.u32 4294901760, %v2824_v14 }
 0x1e4   :  { %v2917_v27 = vsub.f32 %v2824_v14, %v2829_v21  ;;  %v2819_v28 = vpop.permute.xlu0 %2818 }
 0x1e5   :  { %v2826_v29 = vsel %vm1762_vm1, %v2819_v28, 0 }
 0x1e6   :  { %v2918_v30 = vand.u32 4294901760, %v2917_v27  ;;  %v2832_v31 = vand.u32 4294901760, %v2826_v29 }
 0x1e8   :  { %v8467_v33 = vpack.c.bf16 %v2832_v31, %v2829_v21  ;;  %v2924_v34 = vsub.f32 %v2826_v29, %v2832_v31  ;;  %v2919_v37 = vsub.f32 %v2917_v27, %v2918_v30 }
 0x1ea   :  { %v2925_v38 = vand.u32 4294901760, %v2924_v34  ;;  %7720 = vmatprep.subr.bf16.mxu1 %v8467_v33  ;;  %v2920_v41 = vand.u32 4294901760, %v2919_v37  ;;  %v7727_v45 = vpack.c.bf16 %v2924_v34, %v2917_v27  ;;  %v8209_v27 = vmov -1e+30  }
 0x1eb   :  { %7722 = vmatpush3.bf16.xpose.msra.mxu1 %v8467_v33 }
 0x1ec   :  { %v2926_v40 = vsub.f32 %v2924_v34, %v2925_v38  ;;  %v7735_v2 = vpack.c.bf16 %v2925_v38, %v2918_v30 }
 0x1ee   :  { %v2927_v42 = vand.u32 4294901760, %v2926_v40 }
 0x1f0   :  { %v7723_v44 = vpack.c.bf16 %v2927_v42, %v2920_v41 }
 0x1f2   :  { %7214 = vmatmul.mubr.f32.vlgmr.msra.gmra.mrb[6].mxu1 %v2909_v43  ;;  %7724 = vmatprep.subr.bf16.mxu1 %v7723_v44 }
 0x1f3   :  { %7726 = vmatpush3.bf16.xpose.msra.mxu1 %v7723_v44  ;;  %7220 = vmatprep.mubr.f32.mxu1 %v8455_v17 }
 0x1f4   :  { %7728 = vmatprep.subr.bf16.mxu1 %v7727_v45 }
 0x1fa   :  { %7221 = vmatmul.mubr.f32.vlgmr.msra.gmra.mrb[6].mxu1 %v8459_v23 }
 0x1fb   :  { %7730 = vmatpush3.bf16.xpose.msra.mxu1 %v7727_v45  ;;  %7227 = vmatprep.mubr.f32.mxu1 %v2896_v18  ;;  %v1290_v18 = vand.u32 4294901760, %v1289_v9 }
 0x1fc   :  { %7732 = vmatprep.subr.bf16.mxu1 %v8467_v33 }
 0x1fd   :  { %v7631_v20 = vpack.c.bf16 %v1290_v18, %v1283_v15 }
 0x1ff   :  { %7632 = vmatprep.subr.bf16.mxu0 %v7631_v20 }
 0x200   :  { %7634 = vmatpush3.bf16.msra.mxu0 %v7631_v20 }
 0x202   :  { %7228 = vmatmul.mubr.f32.vlgmr.msra.gmra.mrb[6].mxu1 %v8463_v26 }
 0x203   :  { %7734 = vmatpush3.bf16.xpose.msra.mxu1 %v8467_v33  ;;  %7234 = vmatprep.mubr.f32.mxu1 %v2897_v19  ;;  %v7635_v19 = vpack.c.bf16 %v1304_v13, %v1297_v22 }
 0x204   :  { %7736 = vmatprep.subr.bf16.mxu1 %v7735_v2 }
 0x205   :  { %7636 = vmatprep.subr.bf16.mxu0 %v7635_v19 }
 0x206   :  { %7638 = vmatpush3.bf16.msra.mxu0 %v7635_v19 }
 0x207   :  { %7640 = vmatprep.subr.bf16.mxu0 %v7639_v16 }
 0x209   :  { %7079 = vmatmul.mubr.f32.vlgmr.msra.gmra.mrb[2].mxu0 %v8373_v61 }
 0x20a   :  { %7235 = vmatmul.mubr.f32.vlgmr.msra.gmra.mrb[6].mxu1 %v2907_v32  ;;  %7642 = vmatpush3.bf16.msra.mxu0 %v7639_v16 }
 0x20b   :  { %7738 = vmatpush3.bf16.xpose.msra.mxu1 %v7735_v2  ;;  %7241 = vmatprep.mubr.f32.mxu1 %v8455_v17 }
 0x20c   :  { %7740 = vmatprep.subr.bf16.mxu1 %v8467_v33  ;;  %7089 = vmatprep.mubr.f32.mxu0 %v8364_v55  ;;  %v1717_v55 = vlaneseq }
 0x20d   :  { %7644 = vmatprep.subr.bf16.mxu0 %v7643_v25 }
 0x20e   :  { %7646 = vmatpush3.bf16.msra.mxu0 %v7643_v25 }
 0x20f   :  { %7648 = vmatprep.subr.bf16.mxu0 %v8475_v58 }
 0x211   :  { %7090 = vmatmul.mubr.f32.vlgmr.msra.gmra.mrb[2].mxu0 %v8388_v4 }
 0x212   :  { %7242 = vmatmul.mubr.f32.vlgmr.msra.gmra.mrb[6].mxu1 %v8459_v23  ;;  %7650 = vmatpush3.bf16.msra.mxu0 %v8475_v58 }
 0x213   :  { %7742 = vmatpush3.bf16.xpose.msra.mxu1 %v8467_v33  ;;  %7248 = vmatprep.mubr.f32.mxu1 %v8455_v17  ;;  %v7659_v17 = vpack.c.bf16 %v1302_v7, %v1295_v6 }
 0x214   :  { %7100 = vmatprep.mubr.f32.mxu0 %v8378_v63  ;;  %7652 = vmatprep.subr.bf16.mxu0 %v8477_v0  ;;  %v1718_v63 = vshrl.u32 %v1717_v55, 7 }
 0x216   :  { %7654 = vmatpush3.bf16.msra.mxu0 %v8477_v0  ;;  %v1719_v4 = vadd.s32 8, %v1718_v63  ;;  %v1724_v21 = vand.u32 1, %v1718_v63 }
 0x217   :  { %7656 = vmatprep.subr.bf16.mxu0 %v7655_v24 }
 0x219   :  { %7101 = vmatmul.mubr.f32.vlgmr.msra.gmra.mrb[2].mxu0 %v8400_v11  ;;  %v1745_v11 = vand.u32 127, %v1717_v55 }
 0x21a   :  { %7249 = vmatmul.mubr.f32.vlgmr.msra.gmra.mrb[6].mxu1 %v8459_v23  ;;  %7658 = vmatpush3.bf16.msra.mxu0 %v7655_v24  ;;  %v1731_v23 = vand.u32 1, %v1719_v4 }
 0x21b   :  { %7111 = vmatprep.mubr.f32.mxu0 %v8361_v53  ;;  %7660 = vmatprep.subr.bf16.mxu0 %v7659_v17  ;;  %v1750_v14 = vand.u32 1, %v1745_v11 }
 0x21d   :  { %vm1759_vm2 = vcmp.eq.s32.totalorder %v1731_v23, %v1750_v14  ;;  %vm1758_vm3 = vcmp.eq.s32.totalorder %v1724_v21, %v1750_v14 }
 0x21e   :  { %7662 = vmatpush3.bf16.msra.mxu0 %v7659_v17  ;;  %v8510_v28 = vsel %vm1759_vm2, 0.0, %v8209_v27  ;;  %v8512_v30 = vsel %vm1758_vm3, 0.0, %v8209_v27 }
 0x21f   :  { %7664 = vmatprep.subr.bf16.mxu0 %v8475_v58 }
 0x221   :  { %7112 = vmatmul.mubr.f32.vlgmr.msra.gmra.mrb[2].mxu0 %v8373_v61 }
 0x222   :  { %7666 = vmatpush3.bf16.msra.mxu0 %v8475_v58  ;;  %7122 = vmatprep.mubr.f32.mxu0 %v8361_v53 }
 0x223   :  { %7668 = vmatprep.subr.bf16.mxu0 %v8477_v0 }
 0x226   :  { %7670 = vmatpush3.bf16.msra.mxu0 %v8477_v0 }
 0x229   :  { %7123 = vmatmul.mubr.f32.vlgmr.msra.gmra.mrb[2].mxu0 %v8373_v61 }
 0x276   :  { %v7166_v26 = vpop.f32.mrb[4].mxu1 }
 0x277   :  { %v2278_v53 = vmul.f32 0.35355338, %v7166_v26  ;;  %v2267_v29 = vpop.f32.mrb[5].mxu1 }
 0x278   :  { %v2277_v31 = vmul.f32 0.35355338, %v2267_v29 }
 0x279   :  { %v2280_v61 = vadd.f32 %v2278_v53, %v8510_v28 }
 0x27a   :  { %v2279_v32 = vadd.f32 %v2277_v31, %v8512_v30 }
 0x27b   :  { %v2285_v33 = vsel %vm2281_vm4, %v2280_v61, -inf }
 0x27c   :  { %2286 = vmax.xlane.f32.xlu1 %v2285_v33  ;;  %v2282_v34 = vsel %vm2281_vm4, %v2279_v32, -inf }
 0x27d   :  { %2283 = vmax.xlane.f32.xlu0 %v2282_v34 }
 0x2ed   :  { %v7250_v37 = vpop.f32.mrb[6].mxu1 }
 0x2ee   :  { %v3320_v38 = vpop.f32.mrb[7].mxu1  ;;  %v3331_v39 = vmul.f32 0.35355338, %v7250_v37 }
 0x2ef   :  { %v3330_v40 = vmul.f32 0.35355338, %v3320_v38 }
 0x2f0   :  { %v3333_v43 = vadd.f32 %v3331_v39, %v8510_v28 }
 0x2f1   :  { %v3332_v41 = vadd.f32 %v3330_v40, %v8512_v30 }
 0x2f2   :  { %v3337_v44 = vsel %vm2281_vm4, %v3333_v43, -inf }
 0x2f3   :  { %v3334_v42 = vsel %vm2281_vm4, %v3332_v41, -inf }
 0x2f4   :  { %3335 = vmax.xlane.f32.xlu0 %v3334_v42 }
 0x2f8   :  { %3338 = vmax.xlane.f32.xlu0 %v3337_v44 }
 0x2fc   :  { %v7124_v51 = vpop.f32.mrb[2].mxu0 }
 0x2fd   :  { %v8525_v54 = vadd.f32 %v7124_v51, %v6589_v50  ;;  %v1707_v56 = vpop.f32.mrb[3].mxu0 }
 0x2fe   :  { %v8527_v58 = vadd.f32 %v6589_v50, %v1707_v56 }
 0x2ff   :  { %v2314_v60 = vand.u32 4294901760, %v8525_v54 }
 0x300   :  { %v2311_v62 = vand.u32 4294901760, %v8527_v58 }
 0x301   :  { %v2406_v2 = vsub.f32 %v8525_v54, %v2314_v60 }
 0x302   :  { %v8531_v0 = vpack.c.bf16 %v2314_v60, %v2311_v62  ;;  %v2399_v1 = vsub.f32 %v8527_v58, %v2311_v62 }
 0x303   :  { %v2407_v6 = vand.u32 4294901760, %v2406_v2 }
 0x304   :  { %7696 = vmatprep.subr.bf16.mxu0 %v8531_v0  ;;  %v2400_v5 = vand.u32 4294901760, %v2399_v1  ;;  %v7703_v15 = vpack.c.bf16 %v2406_v2, %v2399_v1 }
 0x305   :  { %7698 = vmatpush3.bf16.msra.mxu0 %v8531_v0  ;;  %v2408_v12 = vsub.f32 %v2406_v2, %v2407_v6 }
 0x306   :  { %v2401_v10 = vsub.f32 %v2399_v1, %v2400_v5  ;;  %v7711_v13 = vpack.c.bf16 %v2407_v6, %v2400_v5 }
 0x307   :  { %v2409_v22 = vand.u32 4294901760, %v2408_v12 }
 0x308   :  { %v2402_v18 = vand.u32 4294901760, %v2401_v10 }
 0x309   :  { %v2287_v45 = vpop.xlane.xlu1 %2286 }
 0x30a   :  { %v2289_v46 = vsub.f32 %v2280_v61, %v2287_v45  ;;  %v2284_v48 = vpop.xlane.xlu0 %2283  ;;  %v7699_v20 = vpack.c.bf16 %v2409_v22, %v2402_v18 }
 0x30b   :  { %v2288_v52 = vsub.f32 %v2279_v32, %v2284_v48 }
 0x30c   :  { %v2292_v57 = vmul.f32 1.442695, %v2289_v46  ;;  %7700 = vmatprep.subr.bf16.mxu0 %v7699_v20 }
 0x30d   :  { %v2290_v59 = vmul.f32 1.442695, %v2288_v52 }
 0x30e   :  { %8052 = vpow2.f32 %v2292_v57 }
 0x30f   :  { %8054 = vpow2.f32 %v2290_v59 }
 0x318   :  { %v8053_v3 = vpop.eup %8052 }
 0x319   :  { %v8055_v7 = vpop.eup %8054  ;;  %v2297_v8 = vsel %vm2281_vm4, %v8053_v3, 0.0 }
 0x31a   :  { %2298 = vadd.xlane.f32.xlu0 %v2297_v8  ;;  %v2294_v9 = vsel %vm2281_vm4, %v8055_v7, 0.0 }
 0x31b   :  { %2295 = vadd.xlane.f32.xlu1 %v2294_v9 }
 0x381   :  { %v3336_v19 = vpop.xlane.xlu0 %3335 }
 0x382   :  { %v3340_v16 = vsub.f32 %v3332_v41, %v3336_v19 }
 0x384   :  { %v3342_v25 = vmul.f32 1.442695, %v3340_v16 }
 0x385   :  { %v3339_v24 = vpop.xlane.xlu0 %3338 }
 0x386   :  { %8056 = vpow2.f32 %v3342_v25  ;;  %v3341_v17 = vsub.f32 %v3333_v43, %v3339_v24 }
 0x388   :  { %v3344_v55 = vmul.f32 1.442695, %v3341_v17 }
 0x38a   :  { %8058 = vpow2.f32 %v3344_v55 }
 0x390   :  { %v8539_v63 = vpop.eup %8056 }
 0x391   :  { %v3346_v4 = vsel %vm2281_vm4, %v8539_v63, 0.0 }
 0x392   :  { %3347 = vadd.xlane.f32.xlu1 %v3346_v4 }
 0x394   :  { %v8543_v11 = vpop.eup %8058 }
 0x395   :  { %v3349_v23 = vsel %vm2281_vm4, %v8543_v11, 0.0 }
 0x396   :  { %3350 = vadd.xlane.f32.xlu0 %v3349_v23 }
 0x3a3   :  { %3358 = vrot.lane.b32.xlu1 %v8527_v58, %s8208_s22 }
 0x3a7   :  { %3876 = vrot.lane.b32.xlu1 %v8444_v49, %s8210_s3  ;;  %v2299_v14 = vpop.xlane.xlu0 %2298 }
 0x3a8   :  { %8060 = vrcp.f32 %v2299_v14  ;;  %v2296_v21 = vpop.xlane.xlu1 %2295 }
 0x3a9   :  { %8062 = vrcp.f32 %v2296_v21 }
 0x3ab   :  { %3878 = vrot.lane.b32.xlu1 %v8442_v47, %s8210_s3 }
 0x3ac   :  { %3360 = vrot.lane.b32.xlu0 %v8525_v54, %s8208_s22 }
 0x3af   :  { %3874 = vrot.lane.b32.xlu1 %v8427_v35, %s8210_s3 }
 0x3b0   :  { %3872 = vrot.lane.b32.xlu0 %v8429_v36, %s8210_s3 }
 0x3b2   :  { %v8061_v26 = vpop.eup %8060 }
 0x3b3   :  { %v8063_v27 = vpop.eup %8062  ;;  %v2303_v53 = vmul.f32 %v8061_v26, %v8053_v3 }
 0x3b4   :  { %v2301_v29 = vmul.f32 %v8063_v27, %v8055_v7 }
 0x3b5   :  { %v2308_v31 = vsel %vm2281_vm4, %v2303_v53, 0 }
 0x3b6   :  { %v2305_v61 = vsel %vm2281_vm4, %v2301_v29, 0  ;;  %v2387_v32 = vand.u32 4294901760, %v2308_v31 }
 0x3b7   :  { %v2377_v33 = vand.u32 4294901760, %v2305_v61 }
 0x3b8   :  { %v2388_v34 = vsub.f32 %v2308_v31, %v2387_v32 }
 0x3b9   :  { %v2378_v37 = vsub.f32 %v2305_v61, %v2377_v33 }
 0x3ba   :  { %v2389_v38 = vand.u32 4294901760, %v2388_v34 }
 0x3bb   :  { %v2379_v39 = vand.u32 4294901760, %v2378_v37 }
 0x3bc   :  { %v2390_v40 = vsub.f32 %v2388_v34, %v2389_v38 }
 0x3bd   :  { %v2380_v41 = vsub.f32 %v2378_v37, %v2379_v39 }
 0x3be   :  { %v2391_v43 = vand.u32 4294901760, %v2390_v40 }
 0x3bf   :  { %v2381_v42 = vand.u32 4294901760, %v2380_v41 }
 0x3c1   :  { %7171 = vmatprep.mubr.f32.mxu0 %v2381_v42 }
 0x3c2   :  { %7172 = vmatmul.mubr.f32.vlgmr.msra.gmra.mrb[4].mxu0 %v2391_v43 }
 0x3c3   :  { %7702 = vmatpush3.bf16.msra.mxu0 %v7699_v20  ;;  %7178 = vmatprep.mubr.f32.mxu0 %v2377_v33 }
 0x3c4   :  { %7704 = vmatprep.subr.bf16.mxu0 %v7703_v15 }
 0x3ca   :  { %7179 = vmatmul.mubr.f32.vlgmr.msra.gmra.mrb[4].mxu0 %v2387_v32 }
 0x3cb   :  { %7706 = vmatpush3.bf16.msra.mxu0 %v7703_v15  ;;  %7185 = vmatprep.mubr.f32.mxu0 %v2378_v37 }
 0x3cc   :  { %7708 = vmatprep.subr.bf16.mxu0 %v8531_v0 }
 0x3d2   :  { %7186 = vmatmul.mubr.f32.vlgmr.msra.gmra.mrb[4].mxu0 %v2388_v34 }
 0x3d3   :  { %7710 = vmatpush3.bf16.msra.mxu0 %v8531_v0  ;;  %7192 = vmatprep.mubr.f32.mxu0 %v2379_v39 }
 0x3d4   :  { %7712 = vmatprep.subr.bf16.mxu0 %v7711_v13 }
 0x3da   :  { %7193 = vmatmul.mubr.f32.vlgmr.msra.gmra.mrb[4].mxu0 %v2389_v38 }
 0x3db   :  { %7714 = vmatpush3.bf16.msra.mxu0 %v7711_v13  ;;  %7199 = vmatprep.mubr.f32.mxu0 %v2377_v33 }
 0x3dc   :  { %7716 = vmatprep.subr.bf16.mxu0 %v8531_v0 }
 0x3e2   :  { %7200 = vmatmul.mubr.f32.vlgmr.msra.gmra.mrb[4].mxu0 %v2387_v32 }
 0x3e3   :  { %7718 = vmatpush3.bf16.msra.mxu0 %v8531_v0  ;;  %7206 = vmatprep.mubr.f32.mxu0 %v2377_v33 }
 0x3ea   :  { %7207 = vmatmul.mubr.f32.vlgmr.msra.gmra.mrb[4].mxu0 %v2387_v32 }
 0x41f   :  { %v3348_v44 = vpop.xlane.xlu1 %3347 }
 0x420   :  { %8064 = vrcp.f32 %v3348_v44 }
 0x423   :  { %v3359_v45 = vpop.permute.xlu1 %3358  ;;  %v3351_v46 = vpop.xlane.xlu0 %3350 }
 0x424   :  { %v3371_v48 = vand.u32 4294901760, %v3359_v45  ;;  %8066 = vrcp.f32 %v3351_v46 }
 0x426   :  { %v3459_v50 = vsub.f32 %v3359_v45, %v3371_v48 }
 0x427   :  { %v3361_v51 = vpop.permute.xlu0 %3360  ;;  %v3877_v55 = vpop.permute.xlu1 %3876 }
 0x428   :  { %v3460_v52 = vand.u32 4294901760, %v3459_v50  ;;  %v3374_v56 = vand.u32 4294901760, %v3361_v51  ;;  %v3884_v14 = vsel %vm1762_vm1, %v3877_v55, 0 }
 0x429   :  { %v3889_v27 = vand.u32 4294901760, %v3884_v14 }
 0x42a   :  { %v8065_v57 = vpop.eup %8064  ;;  %v8565_v59 = vpack.c.bf16 %v3374_v56, %v3371_v48  ;;  %v3466_v60 = vsub.f32 %v3361_v51, %v3374_v56  ;;  %v3461_v1 = vsub.f32 %v3459_v50, %v3460_v52 }
 0x42b   :  { %v3353_v62 = vmul.f32 %v8065_v57, %v8539_v63  ;;  %v3879_v63 = vpop.permute.xlu1 %3878  ;;  %v3977_v61 = vsub.f32 %v3884_v14, %v3889_v27 }
 0x42c   :  { %v3467_v0 = vand.u32 4294901760, %v3466_v60  ;;  %7744 = vmatprep.subr.bf16.mxu0 %v8565_v59  ;;  %v3462_v8 = vand.u32 4294901760, %v3461_v1  ;;  %v7751_v17 = vpack.c.bf16 %v3466_v60, %v3459_v50  ;;  %v3886_v23 = vsel %vm1762_vm1, %v3879_v63, 0 }
 0x42d   :  { %7746 = vmatpush3.bf16.msra.mxu0 %v8565_v59  ;;  %v3365_v2 = vsel %vm2281_vm4, %v3353_v62, 0  ;;  %v3892_v26 = vand.u32 4294901760, %v3886_v23  ;;  %v3978_v37 = vand.u32 4294901760, %v3977_v61 }
 0x42e   :  { %v8067_v3 = vpop.eup %8066  ;;  %v3468_v5 = vsub.f32 %v3466_v60, %v3467_v0  ;;  %v3437_v6 = vand.u32 4294901760, %v3365_v2  ;;  %v7759_v4 = vpack.c.bf16 %v3467_v0, %v3460_v52 }
 0x42f   :  { %v3355_v7 = vmul.f32 %v8067_v3, %v8543_v11  ;;  %v3873_v11 = vpop.permute.xlu0 %3872  ;;  %v3984_v29 = vsub.f32 %v3886_v23, %v3892_v26  ;;  %v3875_v31 = vpop.permute.xlu1 %3874  ;;  %v7767_v40 = vpack.c.bf16 %v3892_v26, %v3889_v27  ;;  %v3979_v42 = vsub.f32 %v3977_v61, %v3978_v37 }
 0x430   :  { %v3469_v9 = vand.u32 4294901760, %v3468_v5  ;;  %v3438_v10 = vsub.f32 %v3365_v2, %v3437_v6  ;;  %v3880_v21 = vsel %vm1762_vm1, %v3873_v11, 0  ;;  %v3882_v33 = vsel %vm1762_vm1, %v3875_v31, 0 }
 0x431   :  { %v3368_v12 = vsel %vm2281_vm4, %v3355_v7, 0  ;;  %v3955_v53 = vand.u32 4294901760, %v3880_v21  ;;  %v3985_v34 = vand.u32 4294901760, %v3984_v29  ;;  %v3965_v39 = vand.u32 4294901760, %v3882_v33 }
 0x432   :  { %v7747_v15 = vpack.c.bf16 %v3469_v9, %v3462_v8  ;;  %v3439_v18 = vand.u32 4294901760, %v3438_v10  ;;  %v3447_v22 = vand.u32 4294901760, %v3368_v12  ;;  %v3980_v50 = vand.u32 4294901760, %v3979_v42 }
 0x433   :  { %v3956_v32 = vsub.f32 %v3880_v21, %v3955_v53  ;;  %v3986_v41 = vsub.f32 %v3984_v29, %v3985_v34  ;;  %v3966_v43 = vsub.f32 %v3882_v33, %v3965_v39  ;;  %v7775_v57 = vpack.c.bf16 %v3984_v29, %v3977_v61 }
 0x434   :  { %7748 = vmatprep.subr.bf16.mxu0 %v7747_v15  ;;  %v3440_v13 = vsub.f32 %v3438_v10, %v3439_v18  ;;  %v3448_v20 = vsub.f32 %v3368_v12, %v3447_v22 }
 0x435   :  { %v3957_v38 = vand.u32 4294901760, %v3956_v32  ;;  %v3987_v45 = vand.u32 4294901760, %v3986_v41  ;;  %v3967_v46 = vand.u32 4294901760, %v3966_v43 }
 0x436   :  { %v3441_v19 = vand.u32 4294901760, %v3440_v13  ;;  %v3449_v16 = vand.u32 4294901760, %v3448_v20 }
 0x437   :  { %v3958_v44 = vsub.f32 %v3956_v32, %v3957_v38  ;;  %v7771_v51 = vpack.c.bf16 %v3987_v45, %v3980_v50  ;;  %v3968_v52 = vsub.f32 %v3966_v43, %v3967_v46 }
 0x438   :  { %7255 = vmatprep.mubr.f32.mxu0 %v3441_v19  ;;  %v3450_v25 = vsub.f32 %v3448_v20, %v3449_v16 }
 0x439   :  { %v3959_v48 = vand.u32 4294901760, %v3958_v44  ;;  %v3969_v56 = vand.u32 4294901760, %v3968_v52 }
 0x43a   :  { %v3451_v24 = vand.u32 4294901760, %v3450_v25 }
 0x43c   :  { %7256 = vmatmul.mubr.f32.vlgmr.msra.gmra.mrb[6].mxu0 %v3451_v24 }
 0x43d   :  { %7750 = vmatpush3.bf16.msra.mxu0 %v7747_v15  ;;  %7262 = vmatprep.mubr.f32.mxu0 %v3437_v6 }
 0x43e   :  { %7752 = vmatprep.subr.bf16.mxu0 %v7751_v17 }
 0x444   :  { %7263 = vmatmul.mubr.f32.vlgmr.msra.gmra.mrb[6].mxu0 %v3447_v22 }
 0x445   :  { %7754 = vmatpush3.bf16.msra.mxu0 %v7751_v17  ;;  %7269 = vmatprep.mubr.f32.mxu0 %v3438_v10 }
 0x446   :  { %7756 = vmatprep.subr.bf16.mxu0 %v8565_v59 }
 0x44c   :  { %7270 = vmatmul.mubr.f32.vlgmr.msra.gmra.mrb[6].mxu0 %v3448_v20 }
 0x44d   :  { %7758 = vmatpush3.bf16.msra.mxu0 %v8565_v59  ;;  %7276 = vmatprep.mubr.f32.mxu0 %v3439_v18 }
 0x44e   :  { %7760 = vmatprep.subr.bf16.mxu0 %v7759_v4 }
 0x454   :  { %7277 = vmatmul.mubr.f32.vlgmr.msra.gmra.mrb[6].mxu0 %v3449_v16 }
 0x455   :  { %7762 = vmatpush3.bf16.msra.mxu0 %v7759_v4  ;;  %7283 = vmatprep.mubr.f32.mxu0 %v3437_v6 }
 0x456   :  { %7764 = vmatprep.subr.bf16.mxu0 %v8565_v59 }
 0x45c   :  { %7284 = vmatmul.mubr.f32.vlgmr.msra.gmra.mrb[6].mxu0 %v3447_v22 }
 0x45d   :  { %7766 = vmatpush3.bf16.msra.mxu0 %v8565_v59  ;;  %7290 = vmatprep.mubr.f32.mxu0 %v3437_v6  ;;  %v7783_v59 = vpack.c.bf16 %v3985_v34, %v3978_v37 }
 0x45e   :  { %7768 = vmatprep.subr.bf16.mxu0 %v7767_v40 }
 0x464   :  { %7291 = vmatmul.mubr.f32.vlgmr.msra.gmra.mrb[6].mxu0 %v3447_v22 }
 0x465   :  { %7297 = vmatprep.mubr.f32.mxu0 %v3959_v48 }
 0x466   :  { %7770 = vmatpush3.bf16.xpose.msra.mxu0 %v7767_v40 }
 0x467   :  { %7772 = vmatprep.subr.bf16.mxu0 %v7771_v51 }
 0x46d   :  { %7298 = vmatmul.mubr.f32.vlgmr.msra.gmra.mrb[8].mxu0 %v3969_v56 }
 0x46e   :  { %7774 = vmatpush3.bf16.xpose.msra.mxu0 %v7771_v51  ;;  %7304 = vmatprep.mubr.f32.mxu0 %v3955_v53 }
 0x46f   :  { %7776 = vmatprep.subr.bf16.mxu0 %v7775_v57 }
 0x475   :  { %7305 = vmatmul.mubr.f32.vlgmr.msra.gmra.mrb[8].mxu0 %v3965_v39 }
 0x476   :  { %7778 = vmatpush3.bf16.xpose.msra.mxu0 %v7775_v57  ;;  %7311 = vmatprep.mubr.f32.mxu0 %v3956_v32 }
 0x477   :  { %7780 = vmatprep.subr.bf16.mxu0 %v7767_v40 }
 0x47d   :  { %7312 = vmatmul.mubr.f32.vlgmr.msra.gmra.mrb[8].mxu0 %v3966_v43 }
 0x47e   :  { %7782 = vmatpush3.bf16.xpose.msra.mxu0 %v7767_v40  ;;  %7318 = vmatprep.mubr.f32.mxu0 %v3957_v38 }
 0x47f   :  { %7784 = vmatprep.subr.bf16.mxu0 %v7783_v59 }
 0x485   :  { %7319 = vmatmul.mubr.f32.vlgmr.msra.gmra.mrb[8].mxu0 %v3967_v46 }
 0x486   :  { %7786 = vmatpush3.bf16.xpose.msra.mxu0 %v7783_v59  ;;  %7325 = vmatprep.mubr.f32.mxu0 %v3955_v53 }
 0x487   :  { %7788 = vmatprep.subr.bf16.mxu0 %v7767_v40 }
 0x48d   :  { %7326 = vmatmul.mubr.f32.vlgmr.msra.gmra.mrb[8].mxu0 %v3965_v39 }
 0x48e   :  { %7790 = vmatpush3.bf16.xpose.msra.mxu0 %v7767_v40  ;;  %7332 = vmatprep.mubr.f32.mxu0 %v3955_v53 }
 0x495   :  { %7333 = vmatmul.mubr.f32.vlgmr.msra.gmra.mrb[8].mxu0 %v3965_v39 }
 0x4bd   :  { %v8581_v60 = vpop.f32.mrb[4].mxu0 }
 0x4be   :  { %v8583_v62 = vpop.f32.mrb[5].mxu0 }
 0x537   :  { %v8585_v1 = vpop.f32.mrb[6].mxu0 }
 0x538   :  { %v8587_v0 = vpop.f32.mrb[7].mxu0 }
 0x568   :  { %v7334_v2 = vpop.f32.mrb[8].mxu0 }
 0x569   :  { %v4391_v3 = vmul.f32 0.35355338, %v7334_v2  ;;  %v4380_v5 = vpop.f32.mrb[9].mxu0 }
 0x56a   :  { %v4390_v6 = vmul.f32 0.35355338, %v4380_v5 }
 0x56b   :  { %v4393_v7 = vadd.f32 %v4391_v3, %v8510_v28 }
 0x56c   :  { %v4392_v8 = vadd.f32 %v4390_v6, %v8512_v30 }
 0x56d   :  { %v4397_v9 = vsel %vm2281_vm4, %v4393_v7, -inf }
 0x56e   :  { %4398 = vmax.xlane.f32.xlu1 %v4397_v9  ;;  %v4394_v10 = vsel %vm2281_vm4, %v4392_v8, -inf }
 0x56f   :  { %4395 = vmax.xlane.f32.xlu0 %v4394_v10 }
 0x57f   :  { %4416 = vrot.lane.b32.xlu1 %v8527_v58, %s8210_s3 }
 0x583   :  { %4934 = vrot.lane.b32.xlu1 %v8444_v49, %s8211_s28 }
 0x587   :  { %4936 = vrot.lane.b32.xlu1 %v8442_v47, %s8211_s28 }
 0x58b   :  { %4932 = vrot.lane.b32.xlu1 %v8427_v35, %s8211_s28 }
 0x5fb   :  { %v4399_v12 = vpop.xlane.xlu1 %4398 }
 0x5fc   :  { %v4401_v15 = vsub.f32 %v4393_v7, %v4399_v12  ;;  %v4396_v18 = vpop.xlane.xlu0 %4395 }
 0x5fd   :  { %v4400_v22 = vsub.f32 %v4392_v8, %v4396_v18 }
 0x5fe   :  { %v4404_v13 = vmul.f32 1.442695, %v4401_v15 }
 0x5ff   :  { %v4402_v20 = vmul.f32 1.442695, %v4400_v22  ;;  %v4417_v35 = vpop.permute.xlu1 %4416 }
 0x600   :  { %8068 = vpow2.f32 %v4404_v13  ;;  %v4429_v24 = vand.u32 4294901760, %v4417_v35 }
 0x601   :  { %8070 = vpow2.f32 %v4402_v20 }
 0x602   :  { %v4517_v55 = vsub.f32 %v4417_v35, %v4429_v24 }
 0x603   :  { %v4935_v51 = vpop.permute.xlu1 %4934 }
 0x604   :  { %v4518_v4 = vand.u32 4294901760, %v4517_v55  ;;  %v4942_v2 = vsel %vm1762_vm1, %v4935_v51, 0 }
 0x605   :  { %v4947_v6 = vand.u32 4294901760, %v4942_v2 }
 0x606   :  { %v4519_v27 = vsub.f32 %v4517_v55, %v4518_v4 }
 0x607   :  { %v4937_v52 = vpop.permute.xlu1 %4936  ;;  %v5035_v10 = vsub.f32 %v4942_v2, %v4947_v6 }
 0x608   :  { %v4520_v33 = vand.u32 4294901760, %v4519_v27  ;;  %v4944_v59 = vsel %vm1762_vm1, %v4937_v52, 0 }
 0x609   :  { %v4950_v5 = vand.u32 4294901760, %v4944_v59  ;;  %v5036_v22 = vand.u32 4294901760, %v5035_v10 }
 0x60a   :  { %v8069_v19 = vpop.eup %8068 }
 0x60b   :  { %v4409_v16 = vsel %vm2281_vm4, %v8069_v19, 0.0  ;;  %v8071_v25 = vpop.eup %8070  ;;  %v5042_v8 = vsub.f32 %v4944_v59, %v4950_v5  ;;  %v4933_v9 = vpop.permute.xlu1 %4932 }
 0x60c   :  { %4410 = vadd.xlane.f32.xlu0 %v4409_v16  ;;  %v4406_v49 = vsel %vm2281_vm4, %v8071_v25, 0.0  ;;  %v4940_v15 = vsel %vm1762_vm1, %v4933_v9, 0 }
 0x60d   :  { %v5043_v18 = vand.u32 4294901760, %v5042_v8  ;;  %v5023_v13 = vand.u32 4294901760, %v4940_v15 }
 0x60f   :  { %v5044_v16 = vsub.f32 %v5042_v8, %v5043_v18 }
 0x610   :  { %4407 = vadd.xlane.f32.xlu0 %v4406_v49  ;;  %v5024_v49 = vsub.f32 %v4940_v15, %v5023_v13 }
 0x626   :  { %4418 = vrot.lane.b32.xlu0 %v8525_v54, %s8210_s3 }
 0x62a   :  { %4930 = vrot.lane.b32.xlu0 %v8429_v36, %s8211_s28 }
 0x699   :  { %v4411_v47 = vpop.xlane.xlu0 %4410 }
 0x69a   :  { %8072 = vrcp.f32 %v4411_v47  ;;  %v5045_v47 = vand.u32 4294901760, %v5044_v16 }
 0x69d   :  { %v4408_v17 = vpop.xlane.xlu0 %4407 }
 0x69e   :  { %8074 = vrcp.f32 %v4408_v17 }
 0x6a1   :  { %v4419_v63 = vpop.permute.xlu0 %4418 }
 0x6a2   :  { %v4432_v11 = vand.u32 4294901760, %v4419_v63 }
 0x6a4   :  { %v8073_v23 = vpop.eup %8072  ;;  %v8607_v14 = vpack.c.bf16 %v4432_v11, %v4429_v24  ;;  %v4524_v21 = vsub.f32 %v4419_v63, %v4432_v11  ;;  %v5025_v24 = vand.u32 4294901760, %v5024_v49 }
 0x6a5   :  { %v4415_v26 = vmul.f32 %v8073_v23, %v8069_v19  ;;  %v4931_v57 = vpop.permute.xlu0 %4930  ;;  %v7815_v19 = vpack.c.bf16 %v4950_v5, %v4947_v6  ;;  %v7823_v23 = vpack.c.bf16 %v5042_v8, %v5035_v10 }
 0x6a6   :  { %v4525_v53 = vand.u32 4294901760, %v4524_v21  ;;  %7792 = vmatprep.subr.bf16.mxu1 %v8607_v14  ;;  %v7799_v50 = vpack.c.bf16 %v4524_v21, %v4517_v55  ;;  %v4938_v3 = vsel %vm1762_vm1, %v4931_v57, 0 }
 0x6a7   :  { %7794 = vmatpush3.bf16.msra.mxu1 %v8607_v14  ;;  %v4426_v36 = vsel %vm2281_vm4, %v4415_v26, 0  ;;  %v5013_v7 = vand.u32 4294901760, %v4938_v3 }
 0x6a8   :  { %v8075_v29 = vpop.eup %8074  ;;  %v4526_v31 = vsub.f32 %v4524_v21, %v4525_v53  ;;  %v8612_v61 = vand.u32 4294901760, %v4426_v36  ;;  %v7807_v56 = vpack.c.bf16 %v4525_v53, %v4518_v4  ;;  %v5026_v4 = vsub.f32 %v5024_v49, %v5025_v24 }
 0x6a9   :  { %v4413_v32 = vmul.f32 %v8075_v29, %v8071_v25  ;;  %v5014_v12 = vsub.f32 %v4938_v3, %v5013_v7  ;;  %v5037_v25 = vsub.f32 %v5035_v10, %v5036_v22 }
 0x6aa   :  { %v4527_v34 = vand.u32 4294901760, %v4526_v31  ;;  %v4506_v37 = vsub.f32 %v4426_v36, %v8612_v61  ;;  %v5027_v11 = vand.u32 4294901760, %v5026_v4 }
 0x6ab   :  { %v4423_v38 = vsel %vm2281_vm4, %v4413_v32, 0  ;;  %v5015_v20 = vand.u32 4294901760, %v5014_v12  ;;  %v5038_v55 = vand.u32 4294901760, %v5037_v25 }
 0x6ac   :  { %v7795_v39 = vpack.c.bf16 %v4527_v34, %v4520_v33  ;;  %v4495_v40 = vand.u32 4294901760, %v4423_v38  ;;  %v4507_v41 = vand.u32 4294901760, %v4506_v37 }
 0x6ad   :  { %v5016_v35 = vsub.f32 %v5014_v12, %v5015_v20  ;;  %v7819_v63 = vpack.c.bf16 %v5045_v47, %v5038_v55 }
 0x6ae   :  { %7796 = vmatprep.subr.bf16.mxu1 %v7795_v39  ;;  %v4496_v42 = vsub.f32 %v4423_v38, %v4495_v40  ;;  %v4508_v44 = vsub.f32 %v4506_v37, %v4507_v41 }
 0x6af   :  { %v5017_v17 = vand.u32 4294901760, %v5016_v35 }
 0x6b0   :  { %v4497_v43 = vand.u32 4294901760, %v4496_v42  ;;  %v4509_v48 = vand.u32 4294901760, %v4508_v44 }
 0x6b2   :  { %v4498_v45 = vsub.f32 %v4496_v42, %v4497_v43 }
 0x6b4   :  { %v4499_v46 = vand.u32 4294901760, %v4498_v45 }
 0x6b6   :  { %7339 = vmatprep.mubr.f32.mxu1 %v4499_v46 }
 0x6b7   :  { %7340 = vmatmul.mubr.f32.vlgmr.msra.gmra.mrb[8].mxu1 %v4509_v48 }
 0x6b8   :  { %7798 = vmatpush3.bf16.msra.mxu1 %v7795_v39  ;;  %7346 = vmatprep.mubr.f32.mxu1 %v4495_v40 }
 0x6b9   :  { %7800 = vmatprep.subr.bf16.mxu1 %v7799_v50 }
 0x6bf   :  { %7347 = vmatmul.mubr.f32.vlgmr.msra.gmra.mrb[8].mxu1 %v8612_v61 }
 0x6c0   :  { %7802 = vmatpush3.bf16.msra.mxu1 %v7799_v50  ;;  %7353 = vmatprep.mubr.f32.mxu1 %v4496_v42 }
 0x6c1   :  { %7804 = vmatprep.subr.bf16.mxu1 %v8607_v14 }
 0x6c7   :  { %7354 = vmatmul.mubr.f32.vlgmr.msra.gmra.mrb[8].mxu1 %v4506_v37 }
 0x6c8   :  { %7806 = vmatpush3.bf16.msra.mxu1 %v8607_v14  ;;  %7360 = vmatprep.mubr.f32.mxu1 %v4497_v43 }
 0x6c9   :  { %7808 = vmatprep.subr.bf16.mxu1 %v7807_v56 }
 0x6cf   :  { %7361 = vmatmul.mubr.f32.vlgmr.msra.gmra.mrb[8].mxu1 %v4507_v41 }
 0x6d0   :  { %7810 = vmatpush3.bf16.msra.mxu1 %v7807_v56  ;;  %7367 = vmatprep.mubr.f32.mxu1 %v4495_v40 }
 0x6d1   :  { %7812 = vmatprep.subr.bf16.mxu1 %v8607_v14 }
 0x6d7   :  { %7368 = vmatmul.mubr.f32.vlgmr.msra.gmra.mrb[8].mxu1 %v8612_v61 }
 0x6d8   :  { %7814 = vmatpush3.bf16.msra.mxu1 %v8607_v14  ;;  %7374 = vmatprep.mubr.f32.mxu1 %v4495_v40  ;;  %v7831_v14 = vpack.c.bf16 %v5043_v18, %v5036_v22 }
 0x6d9   :  { %7816 = vmatprep.subr.bf16.mxu1 %v7815_v19 }
 0x6df   :  { %7375 = vmatmul.mubr.f32.vlgmr.msra.gmra.mrb[8].mxu1 %v8612_v61 }
 0x6e0   :  { %7381 = vmatprep.mubr.f32.mxu1 %v5017_v17  ;;  %v6020_v17 = vld [vmem:[#allocation8 + $0x8] sm:$0xff] }
 0x6e1   :  { %7818 = vmatpush3.bf16.xpose.msra.mxu1 %v7815_v19 }
 0x6e2   :  { %7820 = vmatprep.subr.bf16.mxu1 %v7819_v63 }
 0x6e8   :  { %7382 = vmatmul.mubr.f32.vlgmr.msra.gmra.mrb[10].mxu1 %v5027_v11 }
 0x6e9   :  { %7822 = vmatpush3.bf16.xpose.msra.mxu1 %v7819_v63  ;;  %7388 = vmatprep.mubr.f32.mxu1 %v5013_v7  ;;  %v6040_v63 = vand.u32 4294901760, %v6020_v17 }
 0x6ea   :  { %7824 = vmatprep.subr.bf16.mxu1 %v7823_v23 }
 0x6f0   :  { %7389 = vmatmul.mubr.f32.vlgmr.msra.gmra.mrb[10].mxu1 %v5023_v13 }
 0x6f1   :  { %7826 = vmatpush3.bf16.xpose.msra.mxu1 %v7823_v23  ;;  %7395 = vmatprep.mubr.f32.mxu1 %v5014_v12  ;;  %v6134_v23 = vsub.f32 %v6020_v17, %v6040_v63 }
 0x6f2   :  { %7828 = vmatprep.subr.bf16.mxu1 %v7815_v19 }
 0x6f8   :  { %7396 = vmatmul.mubr.f32.vlgmr.msra.gmra.mrb[10].mxu1 %v5024_v49 }
 0x6f9   :  { %7830 = vmatpush3.bf16.xpose.msra.mxu1 %v7815_v19  ;;  %7402 = vmatprep.mubr.f32.mxu1 %v5015_v20 }
 0x6fa   :  { %7832 = vmatprep.subr.bf16.mxu1 %v7831_v14 }
 0x700   :  { %7403 = vmatmul.mubr.f32.vlgmr.msra.gmra.mrb[10].mxu1 %v5025_v24  ;;  %v6019_v24 = vld [vmem:[#allocation8] sm:$0xff] }
 0x701   :  { %7834 = vmatpush3.bf16.xpose.msra.mxu1 %v7831_v14  ;;  %7409 = vmatprep.mubr.f32.mxu1 %v5013_v7  ;;  %v6037_v55 = vand.u32 4294901760, %v6019_v24  ;;  %v6021_v14 = vld [vmem:[#allocation8 + $0x10] sm:$0xff] }
 0x702   :  { %7836 = vmatprep.subr.bf16.mxu1 %v7815_v19 }
 0x703   :  { %v8643_v4 = vpack.c.bf16 %v6040_v63, %v6037_v55  ;;  %v6127_v11 = vsub.f32 %v6019_v24, %v6037_v55 }
 0x708   :  { %7410 = vmatmul.mubr.f32.vlgmr.msra.gmra.mrb[10].mxu1 %v5023_v13 }
 0x709   :  { %7838 = vmatpush3.bf16.xpose.msra.mxu1 %v7815_v19  ;;  %7416 = vmatprep.mubr.f32.mxu1 %v5013_v7 }
 0x710   :  { %7417 = vmatmul.mubr.f32.vlgmr.msra.gmra.mrb[10].mxu1 %v5023_v13 }
 0x7b2   :  { %v7376_v21 = vpop.f32.mrb[8].mxu1 }
 0x7b3   :  { %v4920_v26 = vpop.f32.mrb[9].mxu1 }
 0x7e3   :  { %v7418_v27 = vpop.f32.mrb[10].mxu1 }
 0x7e4   :  { %v5449_v53 = vmul.f32 0.35355338, %v7418_v27  ;;  %v5438_v36 = vpop.f32.mrb[11].mxu1 }
 0x7e5   :  { %v5448_v29 = vmul.f32 0.35355338, %v5438_v36  ;;  %v6135_v36 = vand.u32 4294901760, %v6134_v23 }
 0x7e6   :  { %v5451_v31 = vadd.f32 %v5449_v53, %v8510_v28  ;;  %v6128_v53 = vand.u32 4294901760, %v6127_v11 }
 0x7e7   :  { %v5450_v61 = vadd.f32 %v5448_v29, %v8512_v30 }
 0x7e8   :  { %v5455_v32 = vsel %vm2281_vm4, %v5451_v31, -inf }
 0x7e9   :  { %5456 = vmax.xlane.f32.xlu1 %v5455_v32  ;;  %v5452_v33 = vsel %vm2281_vm4, %v5450_v61, -inf }
 0x7ea   :  { %5453 = vmax.xlane.f32.xlu0 %v5452_v33 }
 0x7fa   :  { %5474 = vrot.lane.b32.xlu1 %v8527_v58, %s8211_s28 }
 0x7fe   :  { %5990 = vrot.lane.b32.xlu1 %v8587_v0, %s8205_s10 }
 0x802   :  { %5992 = vrot.lane.b32.xlu1 %v8585_v1, %s8205_s10 }
 0x806   :  { %6000 = vrot.lane.b32.xlu1 %v7376_v21, %s8212_s29  ;;  %v6022_v21 = vld [vmem:[#allocation8 + $0x18] sm:$0xff] }
 0x807   :  { %v6046_v27 = vand.u32 4294901760, %v6022_v21 }
 0x809   :  { %v6148_v33 = vsub.f32 %v6022_v21, %v6046_v27 }
 0x876   :  { %v5457_v28 = vpop.xlane.xlu1 %5456 }
 0x877   :  { %v5459_v34 = vsub.f32 %v5451_v31, %v5457_v28  ;;  %v5454_v30 = vpop.xlane.xlu0 %5453  ;;  %v6129_v31 = vsub.f32 %v6127_v11, %v6128_v53 }
 0x878   :  { %v5458_v37 = vsub.f32 %v5450_v61, %v5454_v30  ;;  %v6136_v61 = vsub.f32 %v6134_v23, %v6135_v36 }
 0x879   :  { %v5462_v38 = vmul.f32 1.442695, %v5459_v34  ;;  %v6130_v28 = vand.u32 4294901760, %v6129_v31 }
 0x87a   :  { %v5460_v39 = vmul.f32 1.442695, %v5458_v37  ;;  %v5475_v1 = vpop.permute.xlu1 %5474  ;;  %v6137_v34 = vand.u32 4294901760, %v6136_v61 }
 0x87b   :  { %8076 = vpow2.f32 %v5462_v38  ;;  %v5487_v43 = vand.u32 4294901760, %v5475_v1  ;;  %v6149_v38 = vand.u32 4294901760, %v6148_v33 }
 0x87c   :  { %8078 = vpow2.f32 %v5460_v39 }
 0x87d   :  { %v5575_v45 = vsub.f32 %v5475_v1, %v5487_v43 }
 0x87f   :  { %v5576_v48 = vand.u32 4294901760, %v5575_v45 }
 0x881   :  { %v5577_v59 = vsub.f32 %v5575_v45, %v5576_v48 }
 0x883   :  { %v5578_v8 = vand.u32 4294901760, %v5577_v59 }
 0x885   :  { %v8077_v40 = vpop.eup %8076 }
 0x886   :  { %v5467_v41 = vsel %vm2281_vm4, %v8077_v40, 0.0  ;;  %v8079_v58 = vpop.eup %8078 }
 0x887   :  { %5468 = vadd.xlane.f32.xlu0 %v5467_v41  ;;  %v5464_v0 = vsel %vm2281_vm4, %v8079_v58, 0.0 }
 0x88b   :  { %5465 = vadd.xlane.f32.xlu0 %v5464_v0 }
 0x8a1   :  { %5476 = vrot.lane.b32.xlu0 %v8525_v54, %s8211_s28 }
 0x8a5   :  { %5998 = vrot.lane.b32.xlu0 %v4920_v26, %s8212_s29  ;;  %v6043_v26 = vand.u32 4294901760, %v6021_v14 }
 0x8a7   :  { %v8647_v29 = vpack.c.bf16 %v6046_v27, %v6043_v26  ;;  %v6141_v32 = vsub.f32 %v6021_v14, %v6043_v26 }
 0x8a9   :  { %v6142_v30 = vand.u32 4294901760, %v6141_v32 }
 0x8ab   :  { %v6143_v41 = vsub.f32 %v6141_v32, %v6142_v30 }
 0x8ad   :  { %v6144_v0 = vand.u32 4294901760, %v6143_v41 }
 0x914   :  { %v5469_v42 = vpop.xlane.xlu0 %5468 }
 0x915   :  { %8080 = vrcp.f32 %v5469_v42 }
 0x918   :  { %v5466_v44 = vpop.xlane.xlu0 %5465 }
 0x919   :  { %8082 = vrcp.f32 %v5466_v44  ;;  %v7883_v44 = vpack.c.bf16 %v6148_v33, %v6141_v32 }
 0x91c   :  { %v5477_v46 = vpop.permute.xlu0 %5476 }
 0x91d   :  { %v5490_v50 = vand.u32 4294901760, %v5477_v46 }
 0x91f   :  { %v8081_v51 = vpop.eup %8080  ;;  %v7839_v52 = vpack.c.bf16 %v5490_v50, %v5487_v43  ;;  %v5582_v56 = vsub.f32 %v5477_v46, %v5490_v50  ;;  %v7879_v43 = vpack.c.bf16 %v6134_v23, %v6127_v11  ;;  %v7899_v46 = vpack.c.bf16 %v6149_v38, %v6142_v30 }
 0x920   :  { %v5473_v57 = vmul.f32 %v8081_v51, %v8077_v40  ;;  %v7871_v40 = vpack.c.bf16 %v6137_v34, %v6130_v28 }
 0x921   :  { %v5583_v2 = vand.u32 4294901760, %v5582_v56  ;;  %7840 = vmatprep.subr.bf16.mxu0 %v7839_v52  ;;  %v7847_v35 = vpack.c.bf16 %v5582_v56, %v5575_v45  ;;  %v7895_v45 = vpack.c.bf16 %v6135_v36, %v6128_v53 }
 0x922   :  { %7842 = vmatpush3.bf16.msra.mxu0 %v7839_v52  ;;  %v5484_v54 = vsel %vm2281_vm4, %v5473_v57, 0 }
 0x923   :  { %v8083_v3 = vpop.eup %8082  ;;  %v5584_v5 = vsub.f32 %v5582_v56, %v5583_v2  ;;  %v5563_v6 = vand.u32 4294901760, %v5484_v54  ;;  %v7855_v47 = vpack.c.bf16 %v5583_v2, %v5576_v48  ;;  %v5991_v48 = vpop.permute.xlu1 %5990 }
 0x924   :  { %v5471_v7 = vmul.f32 %v8083_v3, %v8079_v58  ;;  %v6150_v58 = vsub.f32 %v6148_v33, %v6149_v38  ;;  %v6012_v57 = vsel %vm1762_vm1, %v8583_v62, %v5991_v48 }
 0x925   :  { %v5585_v9 = vand.u32 4294901760, %v5584_v5  ;;  %v5564_v10 = vsub.f32 %v5484_v54, %v5563_v6 }
 0x926   :  { %v5481_v12 = vsel %vm2281_vm4, %v5471_v7, 0  ;;  %v6151_v1 = vand.u32 4294901760, %v6150_v58 }
 0x927   :  { %v7843_v15 = vpack.c.bf16 %v5585_v9, %v5578_v8  ;;  %v5553_v18 = vand.u32 4294901760, %v5481_v12  ;;  %v5565_v22 = vand.u32 4294901760, %v5564_v10  ;;  %v5993_v50 = vpop.permute.xlu1 %5992 }
 0x928   :  { %v7875_v42 = vpack.c.bf16 %v6151_v1, %v6144_v0  ;;  %v6013_v56 = vsel %vm1762_vm1, %v8581_v60, %v5993_v50 }
 0x929   :  { %7844 = vmatprep.subr.bf16.mxu0 %v7843_v15  ;;  %v5554_v13 = vsub.f32 %v5481_v12, %v5553_v18  ;;  %v5566_v19 = vsub.f32 %v5564_v10, %v5565_v22 }
 0x92b   :  { %v5555_v20 = vand.u32 4294901760, %v5554_v13  ;;  %v5567_v49 = vand.u32 4294901760, %v5566_v19  ;;  %v6001_v51 = vpop.permute.xlu1 %6000  ;;  %v6590_v19 = vld [vmem:[%s8692_s5] ss:$0 sm:$0xff] }
 0x92c   :  { %v6015_v59 = vsel %vm2281_vm4, %v6013_v56, %v6001_v51 }
 0x92d   :  { %v5556_v16 = vsub.f32 %v5554_v13, %v5555_v20 }
 0x92f   :  { %v5557_v25 = vand.u32 4294901760, %v5556_v16 }
 0x931   :  { %7423 = vmatprep.mubr.f32.mxu0 %v5557_v25 }
 0x932   :  { %7424 = vmatmul.mubr.f32.vlgmr.msra.gmra.mrb[10].mxu0 %v5567_v49 }
 0x933   :  { %7846 = vmatpush3.bf16.msra.mxu0 %v7843_v15  ;;  %7430 = vmatprep.mubr.f32.mxu0 %v5553_v18 }
 0x934   :  { %7848 = vmatprep.subr.bf16.mxu0 %v7847_v35 }
 0x93a   :  { %7431 = vmatmul.mubr.f32.vlgmr.msra.gmra.mrb[10].mxu0 %v5563_v6 }
 0x93b   :  { %7850 = vmatpush3.bf16.msra.mxu0 %v7847_v35  ;;  %7437 = vmatprep.mubr.f32.mxu0 %v5554_v13 }
 0x93c   :  { %7852 = vmatprep.subr.bf16.mxu0 %v7839_v52 }
 0x942   :  { %7438 = vmatmul.mubr.f32.vlgmr.msra.gmra.mrb[10].mxu0 %v5564_v10 }
 0x943   :  { %7854 = vmatpush3.bf16.msra.mxu0 %v7839_v52  ;;  %7444 = vmatprep.mubr.f32.mxu0 %v5555_v20 }
 0x944   :  { %7856 = vmatprep.subr.bf16.mxu0 %v7855_v47 }
 0x94a   :  { %7445 = vmatmul.mubr.f32.vlgmr.msra.gmra.mrb[10].mxu0 %v5565_v22 }
 0x94b   :  { %7858 = vmatpush3.bf16.msra.mxu0 %v7855_v47  ;;  %7451 = vmatprep.mubr.f32.mxu0 %v5553_v18 }
 0x94c   :  { %7860 = vmatprep.subr.bf16.mxu0 %v7839_v52 }
 0x952   :  { %7452 = vmatmul.mubr.f32.vlgmr.msra.gmra.mrb[10].mxu0 %v5563_v6 }
 0x953   :  { %7862 = vmatpush3.bf16.msra.mxu0 %v7839_v52  ;;  %7458 = vmatprep.mubr.f32.mxu0 %v5553_v18  ;;  %v5999_v52 = vpop.permute.xlu0 %5998 }
 0x954   :  { %7864 = vmatprep.subr.bf16.mxu0 %v8643_v4  ;;  %v6014_v54 = vsel %vm2281_vm4, %v6012_v57, %v5999_v52 }
 0x95a   :  { %7459 = vmatmul.mubr.f32.vlgmr.msra.gmra.mrb[10].mxu0 %v5563_v6 }
 0x95b   :  { %7866 = vmatpush3.bf16.msra.mxu0 %v8643_v4 }
 0x95c   :  { %7868 = vmatprep.subr.bf16.mxu0 %v8647_v29 }
 0x95f   :  { %7870 = vmatpush3.bf16.msra.mxu0 %v8647_v29 }
 0x960   :  { %7872 = vmatprep.subr.bf16.mxu0 %v7871_v40 }
 0xa2d   :  { %v7460_v37 = vpop.f32.mrb[10].mxu0 }
 0xa2e   :  { %6008 = vrot.lane.b32.xlu1 %v7460_v37, %s8213_s30  ;;  %v5978_v39 = vpop.f32.mrb[11].mxu0 }
 0xa2f   :  { %6006 = vrot.lane.b32.xlu0 %v5978_v39, %s8213_s30 }
 0xaa0   :  { %v6009_v2 = vpop.permute.xlu1 %6008 }
 0xaa1   :  { %v6018_v3 = vsel %vm6016_vm5, %v6015_v59, %v6009_v2  ;;  %v6007_v5 = vpop.permute.xlu0 %6006 }
 0xaa2   :  { %v6034_v6 = vsel %vm94_vm0, %v6018_v3, 0  ;;  %v6017_v7 = vsel %vm6016_vm5, %v6014_v54, %v6007_v5 }
 0xaa3   :  { %v6115_v8 = vand.u32 4294901760, %v6034_v6  ;;  %v6031_v9 = vsel %vm94_vm0, %v6017_v7, 0 }
 0xaa4   :  { %v6105_v10 = vand.u32 4294901760, %v6031_v9 }
 0xaa5   :  { %v6116_v12 = vsub.f32 %v6034_v6, %v6115_v8 }
 0xaa6   :  { %v6106_v15 = vsub.f32 %v6031_v9, %v6105_v10 }
 0xaa7   :  { %v6117_v60 = vand.u32 4294901760, %v6116_v12 }
 0xaa8   :  { %v6107_v18 = vand.u32 4294901760, %v6106_v15 }
 0xaa9   :  { %v6118_v22 = vsub.f32 %v6116_v12, %v6117_v60 }
 0xaaa   :  { %v6108_v62 = vsub.f32 %v6106_v15, %v6107_v18 }
 0xaab   :  { %v6119_v20 = vand.u32 4294901760, %v6118_v22 }
 0xaac   :  { %v6109_v13 = vand.u32 4294901760, %v6108_v62 }
 0xaae   :  { %7469 = vmatprep.mubr.f32.mxu0 %v6109_v13 }
 0xaaf   :  { %7470 = vmatmul.mubr.f32.vlgmr.msra.gmra.mrb[12].mxu0 %v6119_v20 }
 0xab0   :  { %7874 = vmatpush3.bf16.msra.mxu0 %v7871_v40  ;;  %7480 = vmatprep.mubr.f32.mxu0 %v6105_v10 }
 0xab1   :  { %7876 = vmatprep.subr.bf16.mxu0 %v7875_v42 }
 0xab4   :  { %7878 = vmatpush3.bf16.msra.mxu0 %v7875_v42 }
 0xab5   :  { %7880 = vmatprep.subr.bf16.mxu0 %v7879_v43 }
 0xab7   :  { %7481 = vmatmul.mubr.f32.vlgmr.msra.gmra.mrb[12].mxu0 %v6115_v8 }
 0xab8   :  { %7882 = vmatpush3.bf16.msra.mxu0 %v7879_v43  ;;  %7491 = vmatprep.mubr.f32.mxu0 %v6106_v15 }
 0xab9   :  { %7884 = vmatprep.subr.bf16.mxu0 %v7883_v44 }
 0xabc   :  { %7886 = vmatpush3.bf16.msra.mxu0 %v7883_v44 }
 0xabd   :  { %7888 = vmatprep.subr.bf16.mxu0 %v8643_v4 }
 0xabf   :  { %7492 = vmatmul.mubr.f32.vlgmr.msra.gmra.mrb[12].mxu0 %v6116_v12 }
 0xac0   :  { %7890 = vmatpush3.bf16.msra.mxu0 %v8643_v4  ;;  %7502 = vmatprep.mubr.f32.mxu0 %v6107_v18 }
 0xac1   :  { %7892 = vmatprep.subr.bf16.mxu0 %v8647_v29 }
 0xac4   :  { %7894 = vmatpush3.bf16.msra.mxu0 %v8647_v29 }
 0xac5   :  { %7896 = vmatprep.subr.bf16.mxu0 %v7895_v45 }
 0xac7   :  { %7503 = vmatmul.mubr.f32.vlgmr.msra.gmra.mrb[12].mxu0 %v6117_v60 }
 0xac8   :  { %7898 = vmatpush3.bf16.msra.mxu0 %v7895_v45  ;;  %7513 = vmatprep.mubr.f32.mxu0 %v6105_v10 }
 0xac9   :  { %7900 = vmatprep.subr.bf16.mxu0 %v7899_v46 }
 0xacc   :  { %7902 = vmatpush3.bf16.msra.mxu0 %v7899_v46 }
 0xacd   :  { %7904 = vmatprep.subr.bf16.mxu0 %v8643_v4 }
 0xacf   :  { %7514 = vmatmul.mubr.f32.vlgmr.msra.gmra.mrb[12].mxu0 %v6115_v8 }
 0xad0   :  { %7906 = vmatpush3.bf16.msra.mxu0 %v8643_v4  ;;  %7524 = vmatprep.mubr.f32.mxu0 %v6105_v10 }
 0xad1   :  { %7908 = vmatprep.subr.bf16.mxu0 %v8647_v29 }
 0xad4   :  { %7910 = vmatpush3.bf16.msra.mxu0 %v8647_v29 }
 0xad7   :  { %7525 = vmatmul.mubr.f32.vlgmr.msra.gmra.mrb[12].mxu0 %v6115_v8 }
 0xbaa   :  { %v7526_v16 = vpop.f32.mrb[12].mxu0 }
 0xbab   :  { %v7919_v25 = vadd.f32 %v7526_v16, %v6590_v19  ;;  %v6554_v49 = vpop.f32.mrb[13].mxu0 }
 0xbac   :  { %v7920_v35 = vadd.f32 %v6590_v19, %v6554_v49 }
 0xbad   :  { %6565 = vst.msk [vmem:[#allocation10 + $0x8] sm:$0xff] %vm94_vm0, %v7919_v25 }
 0xbae   :  { %6564 = vst.msk [vmem:[#allocation10] sm:$0xff] %vm94_vm0, %v7920_v35 }
 0xbaf   :  { %8183 = shalt.err (!%p8180_p8)
}
 0xbb0   :  { %s8184_s13 = scalar_lea.hbm %s8693_s6, 256 }
 0xbb1   :  { %p8185_p9 = scmp.ne.s32.totalorder %s8693_s6, %s8184_s13  ;;  %p8188_p10 = scmp.lt.u32.totalorder %s8184_s13, %s8693_s6 }
 0xbb3   :  { %p8190_p11 = pnand %p8188_p10, %p8185_p9 }
 0xbb5   :  { %8193 = shalt.err (!%p8190_p11)
}
 0xbb6   :  { %6577 = dma.vmem_to_hbm [thread:$0]  %s6572_s0, 256, %s8693_s6, [#allocation4], %s8204_s9, %s8204_s9, %s8205_s10  }
 0xbb7   :  { %8200 = dma.done.wait [#allocation4], 256  }
 0xbb8   :  { %8201 = vsyncadd [#allocation4], 4294967040 }
 0xbb9   :  { %6581 = vsyncpa [#allocation3], 1 }
 0xbba   :  { %6582 = vsyncpa [#allocation6], 1 }
 0xbbb   :  { %6583 = vsyncpa [#allocation9], 1 }
 0xbbc   :  { %6584 = vsyncpa [#allocation4], 1 }

</bundles_post_ra>
